<compile_context>
chip_gen: v5e
topology: v5e:2x2
jax: 0.10.0
libtpu: 0.0.40
codegen_flags: <defaults>
</compile_context>

<pallas_src>
import functools

import jax
import jax.numpy as jnp
from jax import lax
from jax.experimental import pallas as pl
from jax.experimental.pallas import tpu as pltpu


def _fagcn_kernel(eps, layer_num,
                  x_ref, w1t_ref, b1_ref, w2t_ref, b2_ref,
                  wg_row_ref, wg_col_ref, bg_ref,
                  s_row_ref, s_col_ref, dd_ref, out_ref):
    x = x_ref[...]                                                     # [N, F]
    # h = relu(t1(x))      (F.dropout is identity at inference)
    h = jnp.maximum(
        jnp.dot(x, w1t_ref[...], preferred_element_type=jnp.float32)
        + b1_ref[...], 0.0)                                            # [N, H]
    raw = h

    s_row = s_row_ref[...].astype(jnp.float32)                         # [E, N] one-hot(row)
    s_col = s_col_ref[...].astype(jnp.float32)                         # [E, N] one-hot(col)
    dd = dd_ref[...]                                                   # [E, 1] deg(row)^-.5 * deg(col)^-.5
    wg_row = wg_row_ref[...]                                           # [L, H]
    wg_col = wg_col_ref[...]                                           # [L, H]
    bg = bg_ref[...]                                                   # [L, 1]

    for l in range(layer_num):                                         # static unroll (L=2)
        # gate projected at node level: gp_*[n] = <h[n], wg_*[l]>  (cheap [N,H] pass)
        gp_row = jnp.sum(h * wg_row[l:l + 1, :], axis=-1, keepdims=True)   # [N, 1]
        gp_col = jnp.sum(h * wg_col[l:l + 1, :], axis=-1, keepdims=True)   # [N, 1]
        # gather the two scalar projections onto edges via one-hot matvecs
        g_lin = (jnp.dot(s_row, gp_row, preferred_element_type=jnp.float32)
                 + jnp.dot(s_col, gp_col, preferred_element_type=jnp.float32)
                 + bg[l:l + 1, :])                                      # [E, 1]
        norm = jnp.tanh(g_lin) * dd                                     # [E, 1]
        # gather h[row] and form messages
        h_row = jnp.dot(s_row, h, preferred_element_type=jnp.float32)   # [E, H]
        msg = norm * h_row                                              # [E, H]
        # scatter-add onto col nodes: transposed-LHS contraction (no s_colT operand)
        agg = lax.dot_general(s_col, msg, (((0,), (0,)), ((), ())),
                              preferred_element_type=jnp.float32)       # [N, H]
        h = eps * raw + agg

    logits = (jnp.dot(h, w2t_ref[...], preferred_element_type=jnp.float32)
              + b2_ref[...])                                            # [N, C]
    # log_softmax along class axis
    m = jnp.max(logits, axis=-1, keepdims=True)
    z = logits - m
    lse = jnp.log(jnp.sum(jnp.exp(z), axis=-1, keepdims=True))
    out_ref[...] = z - lse


def fagcn_forward(x, w1t, b1, w2t, b2, wg_row, wg_col, bg,
                  s_row, s_col, dd, *, eps, layer_num):
    n = x.shape[0]
    c = w2t.shape[1]
    kernel = functools.partial(_fagcn_kernel, eps, layer_num)
    vmem = pl.BlockSpec(memory_space=pltpu.MemorySpace.VMEM)
    return pl.pallas_call(
        kernel,
        out_shape=jax.ShapeDtypeStruct((n, c), jnp.float32),
        in_specs=[vmem] * 11,
        out_specs=vmem,
    )(x, w1t, b1, w2t, b2, wg_row, wg_col, bg, s_row, s_col, dd)


def _xavier_normal(key, shape, fan_in, fan_out, gain=1.414):
    std = gain * (2.0 / (fan_in + fan_out)) ** 0.5
    return std * jax.random.normal(key, shape, dtype=jnp.float32)


def _reference(x, w1t, b1, w2t, b2, wg_row, wg_col, bg, row, col, nd,
               eps, layer_num):
    # pure-JAX mirror of the PyTorch forward (eval mode) for verification
    h = jax.nn.relu(x @ w1t + b1)
    raw = h
    for l in range(layer_num):
        h_row = h[row]
        h_col = h[col]
        g = jnp.tanh(h_row @ wg_row[l] + h_col @ wg_col[l] + bg[l, 0])
        norm = g * nd[row] * nd[col]
        agg = jnp.zeros_like(h).at[col].add(norm[:, None] * h_row)
        h = eps * raw + agg
    logits = h @ w2t + b2
    return jax.nn.log_softmax(logits, axis=1)


if __name__ == "__main__":
    N, F, H, C, E, L = 64, 16, 32, 8, 256, 2
    EPS = 0.3
    key = jax.random.PRNGKey(0)
    keys = jax.random.split(key, 10)

    # node features
    x = jax.random.normal(keys[0], (N, F), dtype=jnp.float32)

    # deterministic synthetic graph
    row = jax.random.randint(keys[1], (E,), 0, N)
    col = jax.random.randint(keys[2], (E,), 0, N)

    # FALayer degree normalization: degree(row).clamp(min=1) ** -0.5
    deg = jnp.zeros((N,), jnp.float32).at[row].add(1.0)
    nd = jnp.clip(deg, 1.0, None) ** -0.5

    # parameters (xavier_normal with gain 1.414, small deterministic biases)
    w1t = _xavier_normal(keys[3], (F, H), F, H)          # t1.weight.T
    b1 = 0.01 * jax.random.normal(keys[4], (1, H), dtype=jnp.float32)
    w2t = _xavier_normal(keys[5], (H, C), H, C)          # t2.weight.T
    b2 = 0.01 * jax.random.normal(keys[6], (1, C), dtype=jnp.float32)
    wg = _xavier_normal(keys[7], (L, 2 * H), 2 * H, 1)   # L gate layers, [1, 2H] each
    wg_row = wg[:, :H]                                   # [L, H]
    wg_col = wg[:, H:]                                   # [L, H]
    bg = 0.01 * jax.random.normal(keys[8], (L, 1), dtype=jnp.float32)

    # dense one-hot gather/scatter operators (constant per graph), bf16 = exact 0/1
    s_row = jax.nn.one_hot(row, N, dtype=jnp.bfloat16)   # [E, N]
    s_col = jax.nn.one_hot(col, N, dtype=jnp.bfloat16)   # [E, N]
    dd = (nd[row] * nd[col])[:, None].astype(jnp.float32)  # [E, 1] fused degree norm

    out = fagcn_forward(x, w1t, b1, w2t, b2, wg_row, wg_col, bg,
                        s_row, s_col, dd, eps=EPS, layer_num=L)
    out = jax.block_until_ready(out)

    ref = _reference(x, w1t, b1, w2t, b2, wg_row, wg_col, bg,
                     row, col, nd, EPS, L)
    assert out.shape == (N, C)
    assert jnp.allclose(out, ref, atol=1e-4, rtol=1e-4), "mismatch vs reference"

    print("KERNEL_OK")
</pallas_src>

<mosaic_0001>
module attributes {stable_mosaic.version = 11 : i64} {
  func.func @_fagcn_kernel(%arg0: memref<64x16xf32, #tpu.memory_space<vmem>>, %arg1: memref<16x32xf32, #tpu.memory_space<vmem>>, %arg2: memref<1x32xf32, #tpu.memory_space<vmem>>, %arg3: memref<32x8xf32, #tpu.memory_space<vmem>>, %arg4: memref<1x8xf32, #tpu.memory_space<vmem>>, %arg5: memref<2x32xf32, #tpu.memory_space<vmem>>, %arg6: memref<2x32xf32, #tpu.memory_space<vmem>>, %arg7: memref<2x1xf32, #tpu.memory_space<vmem>>, %arg8: memref<256x64xbf16, #tpu.memory_space<vmem>>, %arg9: memref<256x64xbf16, #tpu.memory_space<vmem>>, %arg10: memref<256x1xf32, #tpu.memory_space<vmem>>, %arg11: memref<64x8xf32, #tpu.memory_space<vmem>>) attributes {dimension_semantics = [], scalar_prefetch = 0 : i64, scratch_operands = 0 : i64, tpu.core_type = #tpu.core_type<tc>} {
    %c0 = arith.constant 0 : index
    %c0_0 = arith.constant 0 : index
    %0 = vector.load %arg0[%c0, %c0_0] : memref<64x16xf32, #tpu.memory_space<vmem>>, vector<64x16xf32>
    %c0_1 = arith.constant 0 : index
    %c0_2 = arith.constant 0 : index
    %1 = vector.load %arg1[%c0_1, %c0_2] : memref<16x32xf32, #tpu.memory_space<vmem>>, vector<16x32xf32>
    %cst = arith.constant dense<0.000000e+00> : vector<64x32xf32>
    %2 = tpu.matmul %0, %1, %cst {dimension_numbers = #tpu.dot_dimension_numbers<[1], [0], [0], [1], [0, 0, 1, 1], [], []>} : vector<64x16xf32>, vector<16x32xf32>, vector<64x32xf32> -> vector<64x32xf32>
    %c0_3 = arith.constant 0 : index
    %c0_4 = arith.constant 0 : index
    %3 = vector.load %arg2[%c0_3, %c0_4] : memref<1x32xf32, #tpu.memory_space<vmem>>, vector<1x32xf32>
    %4 = vector.broadcast %3 : vector<1x32xf32> to vector<64x32xf32>
    %5 = arith.addf %2, %4 : vector<64x32xf32>
    %cst_5 = arith.constant 0.000000e+00 : f32
    %6 = vector.broadcast %cst_5 : f32 to vector<64x32xf32>
    %7 = arith.maximumf %5, %6 : vector<64x32xf32>
    %c0_6 = arith.constant 0 : index
    %c0_7 = arith.constant 0 : index
    %8 = vector.load %arg8[%c0_6, %c0_7] : memref<256x64xbf16, #tpu.memory_space<vmem>>, vector<256x64xbf16>
    %9 = arith.extf %8 : vector<256x64xbf16> to vector<256x64xf32>
    %c0_8 = arith.constant 0 : index
    %c0_9 = arith.constant 0 : index
    %10 = vector.load %arg9[%c0_8, %c0_9] : memref<256x64xbf16, #tpu.memory_space<vmem>>, vector<256x64xbf16>
    %11 = arith.extf %10 : vector<256x64xbf16> to vector<256x64xf32>
    %c0_10 = arith.constant 0 : index
    %c0_11 = arith.constant 0 : index
    %12 = vector.load %arg10[%c0_10, %c0_11] : memref<256x1xf32, #tpu.memory_space<vmem>>, vector<256x1xf32>
    %c0_12 = arith.constant 0 : index
    %c0_13 = arith.constant 0 : index
    %13 = vector.load %arg5[%c0_12, %c0_13] : memref<2x32xf32, #tpu.memory_space<vmem>>, vector<2x32xf32>
    %c0_14 = arith.constant 0 : index
    %c0_15 = arith.constant 0 : index
    %14 = vector.load %arg6[%c0_14, %c0_15] : memref<2x32xf32, #tpu.memory_space<vmem>>, vector<2x32xf32>
    %c0_16 = arith.constant 0 : index
    %c0_17 = arith.constant 0 : index
    %15 = vector.load %arg7[%c0_16, %c0_17] : memref<2x1xf32, #tpu.memory_space<vmem>>, vector<2x1xf32>
    %16 = vector.extract_strided_slice %13 {offsets = [0, 0], sizes = [1, 32], strides = [1, 1]} : vector<2x32xf32> to vector<1x32xf32>
    %17 = vector.broadcast %16 : vector<1x32xf32> to vector<64x32xf32>
    %18 = arith.mulf %7, %17 : vector<64x32xf32>
    %cst_18 = arith.constant dense<0.000000e+00> : vector<64xf32>
    %19 = vector.multi_reduction <add>, %18, %cst_18 [1] : vector<64x32xf32> to vector<64xf32>
    %20 = vector.shape_cast %19 : vector<64xf32> to vector<64x1xf32>
    %21 = vector.extract_strided_slice %14 {offsets = [0, 0], sizes = [1, 32], strides = [1, 1]} : vector<2x32xf32> to vector<1x32xf32>
    %22 = vector.broadcast %21 : vector<1x32xf32> to vector<64x32xf32>
    %23 = arith.mulf %7, %22 : vector<64x32xf32>
    %cst_19 = arith.constant dense<0.000000e+00> : vector<64xf32>
    %24 = vector.multi_reduction <add>, %23, %cst_19 [1] : vector<64x32xf32> to vector<64xf32>
    %25 = vector.shape_cast %24 : vector<64xf32> to vector<64x1xf32>
    %cst_20 = arith.constant dense<0.000000e+00> : vector<256x1xf32>
    %26 = tpu.matmul %9, %20, %cst_20 {dimension_numbers = #tpu.dot_dimension_numbers<[1], [0], [0], [1], [0, 0, 1, 1], [], []>} : vector<256x64xf32>, vector<64x1xf32>, vector<256x1xf32> -> vector<256x1xf32>
    %cst_21 = arith.constant dense<0.000000e+00> : vector<256x1xf32>
    %27 = tpu.matmul %11, %25, %cst_21 {dimension_numbers = #tpu.dot_dimension_numbers<[1], [0], [0], [1], [0, 0, 1, 1], [], []>} : vector<256x64xf32>, vector<64x1xf32>, vector<256x1xf32> -> vector<256x1xf32>
    %28 = arith.addf %26, %27 : vector<256x1xf32>
    %29 = vector.extract_strided_slice %15 {offsets = [0, 0], sizes = [1, 1], strides = [1, 1]} : vector<2x1xf32> to vector<1x1xf32>
    %30 = vector.broadcast %29 : vector<1x1xf32> to vector<256x1xf32>
    %31 = arith.addf %28, %30 : vector<256x1xf32>
    %32 = math.tanh %31 : vector<256x1xf32>
    %33 = arith.mulf %32, %12 : vector<256x1xf32>
    %cst_22 = arith.constant dense<0.000000e+00> : vector<256x32xf32>
    %34 = tpu.matmul %9, %7, %cst_22 {dimension_numbers = #tpu.dot_dimension_numbers<[1], [0], [0], [1], [0, 0, 1, 1], [], []>} : vector<256x64xf32>, vector<64x32xf32>, vector<256x32xf32> -> vector<256x32xf32>
    %35 = vector.broadcast %33 : vector<256x1xf32> to vector<256x32xf32>
    %36 = arith.mulf %35, %34 : vector<256x32xf32>
    %cst_23 = arith.constant dense<0.000000e+00> : vector<64x32xf32>
    %37 = tpu.matmul %11, %36, %cst_23 {dimension_numbers = #tpu.dot_dimension_numbers<[0], [0], [1], [1], [0, 1, 1, 1], [], []>} : vector<256x64xf32>, vector<256x32xf32>, vector<64x32xf32> -> vector<64x32xf32>
    %cst_24 = arith.constant 3.000000e-01 : f32
    %38 = vector.broadcast %cst_24 : f32 to vector<64x32xf32>
    %39 = arith.mulf %38, %7 : vector<64x32xf32>
    %40 = arith.addf %39, %37 : vector<64x32xf32>
    %41 = vector.extract_strided_slice %13 {offsets = [1, 0], sizes = [1, 32], strides = [1, 1]} : vector<2x32xf32> to vector<1x32xf32>
    %42 = vector.broadcast %41 : vector<1x32xf32> to vector<64x32xf32>
    %43 = arith.mulf %40, %42 : vector<64x32xf32>
    %cst_25 = arith.constant dense<0.000000e+00> : vector<64xf32>
    %44 = vector.multi_reduction <add>, %43, %cst_25 [1] : vector<64x32xf32> to vector<64xf32>
    %45 = vector.shape_cast %44 : vector<64xf32> to vector<64x1xf32>
    %46 = vector.extract_strided_slice %14 {offsets = [1, 0], sizes = [1, 32], strides = [1, 1]} : vector<2x32xf32> to vector<1x32xf32>
    %47 = vector.broadcast %46 : vector<1x32xf32> to vector<64x32xf32>
    %48 = arith.mulf %40, %47 : vector<64x32xf32>
    %cst_26 = arith.constant dense<0.000000e+00> : vector<64xf32>
    %49 = vector.multi_reduction <add>, %48, %cst_26 [1] : vector<64x32xf32> to vector<64xf32>
    %50 = vector.shape_cast %49 : vector<64xf32> to vector<64x1xf32>
    %cst_27 = arith.constant dense<0.000000e+00> : vector<256x1xf32>
    %51 = tpu.matmul %9, %45, %cst_27 {dimension_numbers = #tpu.dot_dimension_numbers<[1], [0], [0], [1], [0, 0, 1, 1], [], []>} : vector<256x64xf32>, vector<64x1xf32>, vector<256x1xf32> -> vector<256x1xf32>
    %cst_28 = arith.constant dense<0.000000e+00> : vector<256x1xf32>
    %52 = tpu.matmul %11, %50, %cst_28 {dimension_numbers = #tpu.dot_dimension_numbers<[1], [0], [0], [1], [0, 0, 1, 1], [], []>} : vector<256x64xf32>, vector<64x1xf32>, vector<256x1xf32> -> vector<256x1xf32>
    %53 = arith.addf %51, %52 : vector<256x1xf32>
    %54 = vector.extract_strided_slice %15 {offsets = [1, 0], sizes = [1, 1], strides = [1, 1]} : vector<2x1xf32> to vector<1x1xf32>
    %55 = vector.broadcast %54 : vector<1x1xf32> to vector<256x1xf32>
    %56 = arith.addf %53, %55 : vector<256x1xf32>
    %57 = math.tanh %56 : vector<256x1xf32>
    %58 = arith.mulf %57, %12 : vector<256x1xf32>
    %cst_29 = arith.constant dense<0.000000e+00> : vector<256x32xf32>
    %59 = tpu.matmul %9, %40, %cst_29 {dimension_numbers = #tpu.dot_dimension_numbers<[1], [0], [0], [1], [0, 0, 1, 1], [], []>} : vector<256x64xf32>, vector<64x32xf32>, vector<256x32xf32> -> vector<256x32xf32>
    %60 = vector.broadcast %58 : vector<256x1xf32> to vector<256x32xf32>
    %61 = arith.mulf %60, %59 : vector<256x32xf32>
    %cst_30 = arith.constant dense<0.000000e+00> : vector<64x32xf32>
    %62 = tpu.matmul %11, %61, %cst_30 {dimension_numbers = #tpu.dot_dimension_numbers<[0], [0], [1], [1], [0, 1, 1, 1], [], []>} : vector<256x64xf32>, vector<256x32xf32>, vector<64x32xf32> -> vector<64x32xf32>
    %cst_31 = arith.constant 3.000000e-01 : f32
    %63 = vector.broadcast %cst_31 : f32 to vector<64x32xf32>
    %64 = arith.mulf %63, %7 : vector<64x32xf32>
    %65 = arith.addf %64, %62 : vector<64x32xf32>
    %c0_32 = arith.constant 0 : index
    %c0_33 = arith.constant 0 : index
    %66 = vector.load %arg3[%c0_32, %c0_33] : memref<32x8xf32, #tpu.memory_space<vmem>>, vector<32x8xf32>
    %cst_34 = arith.constant dense<0.000000e+00> : vector<64x8xf32>
    %67 = tpu.matmul %65, %66, %cst_34 {dimension_numbers = #tpu.dot_dimension_numbers<[1], [0], [0], [1], [0, 0, 1, 1], [], []>} : vector<64x32xf32>, vector<32x8xf32>, vector<64x8xf32> -> vector<64x8xf32>
    %c0_35 = arith.constant 0 : index
    %c0_36 = arith.constant 0 : index
    %68 = vector.load %arg4[%c0_35, %c0_36] : memref<1x8xf32, #tpu.memory_space<vmem>>, vector<1x8xf32>
    %69 = vector.broadcast %68 : vector<1x8xf32> to vector<64x8xf32>
    %70 = arith.addf %67, %69 : vector<64x8xf32>
    %cst_37 = arith.constant dense<0xFF800000> : vector<64xf32>
    %71 = vector.multi_reduction <maximumf>, %70, %cst_37 [1] : vector<64x8xf32> to vector<64xf32>
    %72 = vector.shape_cast %71 : vector<64xf32> to vector<64x1xf32>
    %73 = vector.broadcast %72 : vector<64x1xf32> to vector<64x8xf32>
    %74 = arith.subf %70, %73 : vector<64x8xf32>
    %75 = math.exp %74 : vector<64x8xf32>
    %cst_38 = arith.constant dense<0.000000e+00> : vector<64xf32>
    %76 = vector.multi_reduction <add>, %75, %cst_38 [1] : vector<64x8xf32> to vector<64xf32>
    %77 = vector.shape_cast %76 : vector<64xf32> to vector<64x1xf32>
    %78 = math.log %77 : vector<64x1xf32>
    %79 = vector.broadcast %78 : vector<64x1xf32> to vector<64x8xf32>
    %80 = arith.subf %74, %79 : vector<64x8xf32>
    %c0_39 = arith.constant 0 : index
    %c0_40 = arith.constant 0 : index
    %81 = vector.load %arg11[%c0_39, %c0_40] : memref<64x8xf32, #tpu.memory_space<vmem>>, vector<64x8xf32>
    tpu.vector_store %arg11[%c0_39, %c0_40], %80 {strides = array<i32>} : memref<64x8xf32, #tpu.memory_space<vmem>>, vector<64x8xf32>,
    return
  }
}

</mosaic_0001>

<bundles_post_ra>
// kernel: tpu_custom_call.1
= control target key start
LH: loop header
LB: loop body
LE: loop exit
PB: predicated region body
PF: predicated region fallthrough
CT: control target
= control target key end

     0   :  { %vm52_vm0 = vcmask 130048   ;;  %vm298_vm1 = vcmask 261120   ;;  %vm356_vm2 = vcmask 523264   ;;  %vm2196_vm3 = vcmask 64512   ;;  %s4593_s1 = inlined_call_operand.vmem [shape: f32[16,32], index: 1, kind: input, shape index: {}]   ;;  %s4594_s0 = inlined_call_operand.vmem [shape: f32[64,16], index: 0, kind: input, shape index: {}]   ;;  %s4595_s2 = inlined_call_operand.vmem [shape: f32[1,32], index: 2, kind: input, shape index: {}]   ;;  %s4596_s5 = inlined_call_operand.vmem [shape: f32[2,32], index: 5, kind: input, shape index: {}]   ;;  %s4597_s6 = inlined_call_operand.vmem [shape: f32[2,32], index: 6, kind: input, shape index: {}]   ;;  %s4598_s8 = inlined_call_operand.vmem [shape: bf16[256,64], index: 8, kind: input, shape index: {}]   ;;  %s4599_s9 = inlined_call_operand.vmem [shape: bf16[256,64], index: 9, kind: input, shape index: {}]   ;;  %s4600_s7 = inlined_call_operand.vmem [shape: f32[2,1], index: 7, kind: input, shape index: {}]   ;;  %s4601_s10 = inlined_call_operand.vmem [shape: f32[256,1], index: 10, kind: input, shape index: {}]   ;;  %s4602_s3 = inlined_call_operand.vmem [shape: f32[32,8], index: 3, kind: input, shape index: {}]   ;;  %s4603_s4 = inlined_call_operand.vmem [shape: f32[1,8], index: 4, kind: input, shape index: {}]   ;;  %s4604_s11 = inlined_call_operand.vmem [shape: f32[64,8], index: 11, kind: output, shape index: {}]  }
   0x1   :  { %v47_v0 = vld [vmem:[%s4593_s1 + $0x8] sm:$0xff]  ;;  %v46_v1 = vld [vmem:[%s4593_s1] sm:$0xff]  ;;  %v40_v4 = vld [vmem:[%s4594_s0 + $0x10] sm:$0xff] }
   0x2   :  { %91 = vmatpush.msra.mxu0 %v47_v0  ;;  %v38_v2 = vld [vmem:[%s4594_s0] sm:$0xff]  ;;  %v39_v3 = vld [vmem:[%s4594_s0 + $0x8] sm:$0xff]  ;;  %v41_v5 = vld [vmem:[%s4594_s0 + $0x18] sm:$0xff] }
   0x3   :  { %v42_v6 = vld [vmem:[%s4594_s0 + $0x20] sm:$0xff]  ;;  %v43_v7 = vld [vmem:[%s4594_s0 + $0x28] sm:$0xff]  ;;  %v44_v8 = vld [vmem:[%s4594_s0 + $0x30] sm:$0xff] }
   0x4   :  { %92 = vmatpush.msra.mxu0 %v46_v1  ;;  %v45_v9 = vld [vmem:[%s4594_s0 + $0x38] sm:$0xff]  ;;  %v2750_v12 = vld [vmem:[%s4595_s2] ss:$0 sm:$0xff] }
   0x5   :  { %2305 = vmatmul.msk.f32.vlgmr.msra.gmra.mxu0 %vm52_vm0, %v38_v2  ;;  %v286_v14 = vld [vmem:[%s4596_s5] sm:$0x3] }
   0x6   :  { %v289_v17 = vperm.slane %v286_v14, 0  ;;  %v287_v44 = vld [vmem:[%s4597_s6] sm:$0x3] }
   0x7   :  { %v323_v47 = vperm.slane %v287_v44, 0 }
   0xd   :  { %2306 = vmatmul.msk.f32.gmra.mxu0 %vm52_vm0, %v39_v3 }
  0x15   :  { %2307 = vmatmul.msk.f32.gmra.mxu0 %vm52_vm0, %v40_v4 }
  0x1d   :  { %2308 = vmatmul.msk.f32.gmra.mxu0 %vm52_vm0, %v41_v5 }
  0x25   :  { %2309 = vmatmul.msk.f32.gmra.mxu0 %vm52_vm0, %v42_v6 }
  0x2d   :  { %2310 = vmatmul.msk.f32.gmra.mxu0 %vm52_vm0, %v43_v7 }
  0x35   :  { %2311 = vmatmul.msk.f32.gmra.mxu0 %vm52_vm0, %v44_v8 }
  0x3d   :  { %2312 = vmatmul.msk.f32.gmra.mxu0 %vm52_vm0, %v45_v9 }
  0x82   :  { %v94_v10 = vpop.f32.mrf.mxu0 }
  0x83   :  { %v95_v32 = vadd.f32 %v2750_v12, %v94_v10 }
  0x85   :  { %v3068_v35 = vmax.f32 %v95_v32, 0.0 }
  0x87   :  { %4712 = vst [vmem:[#allocation6_spill] sm:$0xff] %v3068_v35  ;;  %v290_v40 = vmul.f32 %v289_v17, %v3068_v35  ;;  %v324_v5 = vmul.f32 %v323_v47, %v3068_v35 }
  0x89   :  { %v299_v43 = vsel %vm298_vm1, %v290_v40, 0.0  ;;  %v332_v6 = vsel %vm298_vm1, %v324_v5, 0.0 }
  0x8a   :  { %v97_v11 = vpop.f32.mrf.mxu0 }
  0x8b   :  { %v98_v48 = vadd.f32 %v2750_v12, %v97_v11 }
  0x8d   :  { %v3085_v53 = vmax.f32 %v98_v48, 0.0 }
  0x8f   :  { %4715 = vst [vmem:[#allocation9_spill] sm:$0xff] %v3085_v53  ;;  %v291_v58 = vmul.f32 %v289_v17, %v3085_v53  ;;  %v325_v63 = vmul.f32 %v323_v47, %v3085_v53 }
  0x91   :  { %v302_v61 = vsel %vm298_vm1, %v291_v58, 0.0  ;;  %v335_v1 = vsel %vm298_vm1, %v325_v63, 0.0 }
  0x92   :  { %v100_v13 = vpop.f32.mrf.mxu0 }
  0x93   :  { %v101_v15 = vadd.f32 %v2750_v12, %v100_v13 }
  0x95   :  { %v3053_v16 = vmax.f32 %v101_v15, 0.0 }
  0x97   :  { %4708 = vst [vmem:[#allocation2_spill] sm:$0xff] %v3053_v16  ;;  %v292_v18 = vmul.f32 %v289_v17, %v3053_v16  ;;  %v326_v59 = vmul.f32 %v323_v47, %v3053_v16 }
  0x99   :  { %v305_v19 = vsel %vm298_vm1, %v292_v18, 0.0  ;;  %v338_v62 = vsel %vm298_vm1, %v326_v59, 0.0  ;;  %v2654_v18 = vld [vmem:[%s4598_s8 + $0x70] sm:$0xff]   ;;  %v2659_v59 = vld [vmem:[%s4599_s9 + $0x20] sm:$0xff]  }
  0x9a   :  { %v103_v20 = vpop.f32.mrf.mxu0  ;;  %306 = vadd.xlane.f32.xlu2 %v305_v19  ;;  %v3166_v44 = vunpack.c.h.bf16 %v2654_v18  ;;  %v3229_v63 = vunpack.c.h.bf16 %v2659_v59 }
  0x9b   :  { %v104_v21 = vadd.f32 %v2750_v12, %v103_v20  ;;  %v3112_v20 = vunpack.c.l.bf16 %v2654_v18 }
  0x9c   :  { %4725 = vst [vmem:[#allocation19_spill] sm:$0xff] %v3166_v44 }
  0x9d   :  { %v3057_v22 = vmax.f32 %v104_v21, 0.0  ;;  %4717 = vst [vmem:[#allocation11_spill] sm:$0xff] %v3112_v20 }
  0x9e   :  { %4737 = vst [vmem:[#allocation31_spill] sm:$0xff] %v3229_v63 }
  0x9f   :  { %4709 = vst [vmem:[#allocation3_spill] sm:$0xff] %v3057_v22  ;;  %v293_v23 = vmul.f32 %v289_v17, %v3057_v22  ;;  %v327_v3 = vmul.f32 %v323_v47, %v3057_v22 }
  0xa1   :  { %v308_v24 = vsel %vm298_vm1, %v293_v23, 0.0  ;;  %v341_v4 = vsel %vm298_vm1, %v327_v3, 0.0 }
  0xa2   :  { %v106_v25 = vpop.f32.mrf.mxu0  ;;  %309 = vadd.xlane.f32.xlu2 %v308_v24 }
  0xa3   :  { %v107_v26 = vadd.f32 %v2750_v12, %v106_v25 }
  0xa5   :  { %v3061_v27 = vmax.f32 %v107_v26, 0.0 }
  0xa7   :  { %4710 = vst [vmem:[#allocation4_spill] sm:$0xff] %v3061_v27  ;;  %v294_v28 = vmul.f32 %v289_v17, %v3061_v27  ;;  %v328_v57 = vmul.f32 %v323_v47, %v3061_v27 }
  0xa9   :  { %v311_v29 = vsel %vm298_vm1, %v294_v28, 0.0  ;;  %v344_v60 = vsel %vm298_vm1, %v328_v57, 0.0  ;;  %v2641_v28 = vld [vmem:[%s4598_s8 + $0x8] sm:$0xff]   ;;  %v2643_v57 = vld [vmem:[%s4598_s8 + $0x18] sm:$0xff]  }
  0xaa   :  { %v109_v30 = vpop.f32.mrf.mxu0  ;;  %312 = vadd.xlane.f32.xlu1 %v311_v29  ;;  %v3151_v40 = vunpack.c.h.bf16 %v2641_v28 }
  0xab   :  { %v110_v31 = vadd.f32 %v2750_v12, %v109_v30  ;;  %v2657_v30 = vld [vmem:[%s4599_s9 + $0x10] sm:$0xff]  }
  0xac   :  { %4722 = vst [vmem:[#allocation16_spill] sm:$0xff] %v3151_v40 }
  0xad   :  { %v3065_v33 = vmax.f32 %v110_v31, 0.0  ;;  %v2578_v31 = vld [vmem:[%s4599_s9] sm:$0xff]  }
  0xaf   :  { %4711 = vst [vmem:[#allocation5_spill] sm:$0xff] %v3065_v33  ;;  %v295_v34 = vmul.f32 %v289_v17, %v3065_v33  ;;  %v329_v50 = vmul.f32 %v323_v47, %v3065_v33 }
  0xb1   :  { %v314_v36 = vsel %vm298_vm1, %v295_v34, 0.0  ;;  %v347_v56 = vsel %vm298_vm1, %v329_v50, 0.0  ;;  %v3137_v34 = vunpack.c.l.bf16 %v2641_v28 }
  0xb2   :  { %v112_v37 = vpop.f32.mrf.mxu0  ;;  %315 = vadd.xlane.f32.xlu1 %v314_v36  ;;  %v3140_v36 = vunpack.c.l.bf16 %v2657_v30 }
  0xb3   :  { %v113_v38 = vadd.f32 %v2750_v12, %v112_v37  ;;  %4719 = vst [vmem:[#allocation13_spill] sm:$0xff] %v3137_v34  ;;  %v3142_v37 = vunpack.c.l.bf16 %v2578_v31 }
  0xb4   :  { %4720 = vst [vmem:[#allocation14_spill] sm:$0xff] %v3140_v36 }
  0xb5   :  { %v3071_v39 = vmax.f32 %v113_v38, 0.0  ;;  %4721 = vst [vmem:[#allocation15_spill] sm:$0xff] %v3142_v37 }
  0xb7   :  { %4713 = vst [vmem:[#allocation7_spill] sm:$0xff] %v3071_v39  ;;  %v296_v41 = vmul.f32 %v289_v17, %v3071_v39  ;;  %v330_v0 = vmul.f32 %v323_v47, %v3071_v39 }
  0xb9   :  { %v317_v42 = vsel %vm298_vm1, %v296_v41, 0.0  ;;  %v350_v2 = vsel %vm298_vm1, %v330_v0, 0.0  ;;  %v3153_v41 = vunpack.c.h.bf16 %v2657_v30  ;;  %v2644_v0 = vld [vmem:[%s4598_s8 + $0x20] sm:$0xff]  }
  0xba   :  { %v115_v45 = vpop.f32.mrf.mxu0  ;;  %318 = vadd.xlane.f32.xlu0 %v317_v42  ;;  %300 = vadd.xlane.f32.xlu1 %v299_v43  ;;  %v3155_v42 = vunpack.c.h.bf16 %v2578_v31  ;;  %v2642_v43 = vld [vmem:[%s4598_s8 + $0x10] sm:$0xff]   ;;  %v2648_v30 = vld [vmem:[%s4598_s8 + $0x40] sm:$0xff]   ;;  %v2664_v31 = vld [vmem:[%s4599_s9 + $0x48] sm:$0xff]  }
  0xbb   :  { %v116_v46 = vadd.f32 %v2750_v12, %v115_v45  ;;  %4723 = vst [vmem:[#allocation17_spill] sm:$0xff] %v3153_v41  ;;  %v2658_v45 = vld [vmem:[%s4599_s9 + $0x18] sm:$0xff]  }
  0xbc   :  { %4724 = vst [vmem:[#allocation18_spill] sm:$0xff] %v3155_v42  ;;  %v3178_v48 = vunpack.c.l.bf16 %v2658_v45 }
  0xbd   :  { %v3080_v49 = vmax.f32 %v116_v46, 0.0  ;;  %v2656_v46 = vld [vmem:[%s4599_s9 + $0x8] sm:$0xff]  }
  0xbe   :  { %4727 = vst [vmem:[#allocation21_spill] sm:$0xff] %v3178_v48  ;;  %v3180_v50 = vunpack.c.l.bf16 %v2656_v46 }
  0xbf   :  { %4714 = vst [vmem:[#allocation8_spill] sm:$0xff] %v3080_v49  ;;  %v297_v51 = vmul.f32 %v289_v17, %v3080_v49  ;;  %v331_v52 = vmul.f32 %v323_v47, %v3080_v49  ;;  %v2514_v17 = vld [vmem:[%s4598_s8] sm:$0xff]   ;;  %v3174_v47 = vunpack.c.l.bf16 %v2642_v43 }
  0xc0   :  { %v3110_v19 = vunpack.c.l.bf16 %v2514_v17  ;;  %v3120_v25 = vunpack.c.h.bf16 %v2514_v17  ;;  %4728 = vst [vmem:[#allocation22_spill] sm:$0xff] %v3180_v50 }
  0xc1   :  { %v320_v54 = vsel %vm298_vm1, %v297_v51, 0.0  ;;  %v353_v55 = vsel %vm298_vm1, %v331_v52, 0.0  ;;  %4726 = vst [vmem:[#allocation20_spill] sm:$0xff] %v3174_v47  ;;  %v2655_v51 = vld [vmem:[%s4598_s8 + $0x78] sm:$0xff]  }
  0xc2   :  { %321 = vadd.xlane.f32.xlu0 %v320_v54  ;;  %354 = vadd.xlane.f32.xlu2 %v353_v55  ;;  %4716 = vst [vmem:[#allocation10_spill] sm:$0xff] %v3110_v19  ;;  %v3191_v52 = vunpack.c.l.bf16 %v2655_v51  ;;  %v3193_v54 = vunpack.c.h.bf16 %v2642_v43  ;;  %v3197_v55 = vunpack.c.h.bf16 %v2658_v45  ;;  %v3210_v58 = vunpack.c.h.bf16 %v2655_v51  ;;  %v2649_v51 = vld [vmem:[%s4598_s8 + $0x48] sm:$0xff]  }
  0xc3   :  { %348 = vadd.xlane.f32.xlu1 %v347_v56  ;;  %4718 = vst [vmem:[#allocation12_spill] sm:$0xff] %v3120_v25  ;;  %v3199_v56 = vunpack.c.h.bf16 %v2656_v46  ;;  %v3389_v45 = vunpack.c.h.bf16 %v2648_v30  ;;  %v3393_v46 = vunpack.c.h.bf16 %v2664_v31 }
  0xc4   :  { %4729 = vst [vmem:[#allocation23_spill] sm:$0xff] %v3191_v52 }
  0xc5   :  { %4730 = vst [vmem:[#allocation24_spill] sm:$0xff] %v3193_v54 }
  0xc6   :  { %4731 = vst [vmem:[#allocation25_spill] sm:$0xff] %v3197_v55 }
  0xc7   :  { %4732 = vst [vmem:[#allocation26_spill] sm:$0xff] %v3199_v56 }
  0xc8   :  { %4733 = vst [vmem:[#allocation27_spill] sm:$0xff] %v3210_v58 }
  0xc9   :  { %4753 = vst [vmem:[#allocation47_spill] sm:$0xff] %v3389_v45 }
  0xca   :  { %345 = vadd.xlane.f32.xlu2 %v344_v60  ;;  %303 = vadd.xlane.f32.xlu0 %v302_v61  ;;  %v3215_v60 = vunpack.c.l.bf16 %v2643_v57  ;;  %v3219_v61 = vunpack.c.l.bf16 %v2659_v59  ;;  %v2665_v59 = vld [vmem:[%s4599_s9 + $0x50] sm:$0xff]  }
  0xcb   :  { %339 = vadd.xlane.f32.xlu1 %v338_v62  ;;  %v3225_v62 = vunpack.c.h.bf16 %v2643_v57 }
  0xcc   :  { %4734 = vst [vmem:[#allocation28_spill] sm:$0xff] %v3215_v60 }
  0xcd   :  { %4735 = vst [vmem:[#allocation29_spill] sm:$0xff] %v3219_v61 }
  0xce   :  { %4736 = vst [vmem:[#allocation30_spill] sm:$0xff] %v3225_v62 }
  0xd2   :  { %336 = vadd.xlane.f32.xlu2 %v335_v1  ;;  %351 = vadd.xlane.f32.xlu0 %v350_v2  ;;  %v2660_v1 = vld [vmem:[%s4599_s9 + $0x28] sm:$0xff]   ;;  %v3241_v2 = vunpack.c.l.bf16 %v2644_v0 }
  0xd3   :  { %v3245_v3 = vunpack.c.l.bf16 %v2660_v1  ;;  %v3255_v5 = vunpack.c.h.bf16 %v2660_v1  ;;  %v3411_v1 = vunpack.c.l.bf16 %v2665_v59 }
  0xd4   :  { %4738 = vst [vmem:[#allocation32_spill] sm:$0xff] %v3241_v2 }
  0xd5   :  { %4739 = vst [vmem:[#allocation33_spill] sm:$0xff] %v3245_v3 }
  0xd6   :  { %4741 = vst [vmem:[#allocation35_spill] sm:$0xff] %v3255_v5 }
  0xda   :  { %342 = vadd.xlane.f32.xlu0 %v341_v4  ;;  %v3251_v4 = vunpack.c.h.bf16 %v2644_v0  ;;  %v3407_v0 = vunpack.c.l.bf16 %v2649_v51 }
  0xdc   :  { %4740 = vst [vmem:[#allocation34_spill] sm:$0xff] %v3251_v4 }
  0xdd   :  { %4754 = vst [vmem:[#allocation48_spill] sm:$0xff] %v3407_v0 }
  0xe2   :  { %333 = vadd.xlane.f32.xlu0 %v332_v6  ;;  %v2662_v6 = vld [vmem:[%s4599_s9 + $0x38] sm:$0xff]  }
 0x10d   :  { %v307_v7 = vpop.xlane.xlu2 %306 }
 0x115   :  { %v310_v9 = vpop.xlane.xlu2 %309 }
 0x11d   :  { %v313_v8 = vpop.xlane.xlu1 %312 }
 0x125   :  { %v316_v11 = vpop.xlane.xlu1 %315 }
 0x12d   :  { %v319_v10 = vpop.xlane.xlu0 %318  ;;  %v301_v14 = vpop.xlane.xlu1 %300 }
 0x135   :  { %v322_v12 = vpop.xlane.xlu0 %321  ;;  %v355_v13 = vpop.xlane.xlu2 %354 }
 0x136   :  { %461 = vmatpush.msra.mxu0 %v355_v13  ;;  %2671 = vmatpush.msra.mxu1 %v355_v13  ;;  %v349_v23 = vpop.xlane.xlu1 %348 }
 0x137   :  { %670 = vmatpush.msra.mxu2 %v322_v12  ;;  %2679 = vmatpush.msra.mxu3 %v322_v12 }
 0x139   :  { %671 = vmatpush.msra.mxu2 %v319_v10  ;;  %2680 = vmatpush.msra.mxu3 %v319_v10  ;;  %v2661_v10 = vld [vmem:[%s4599_s9 + $0x30] sm:$0xff]  }
 0x13a   :  { %v3278_v12 = vunpack.c.h.bf16 %v2661_v10  ;;  %v3283_v13 = vunpack.c.l.bf16 %v2661_v10  ;;  %v3421_v10 = vunpack.c.h.bf16 %v2649_v51  ;;  %v2666_v51 = vld [vmem:[%s4599_s9 + $0x58] sm:$0xff]  }
 0x13b   :  { %672 = vmatpush.msra.mxu2 %v316_v11  ;;  %2681 = vmatpush.msra.mxu3 %v316_v11 }
 0x13c   :  { %4745 = vst [vmem:[#allocation39_spill] sm:$0xff] %v3278_v12 }
 0x13d   :  { %673 = vmatpush.msra.mxu2 %v313_v8  ;;  %2682 = vmatpush.msra.mxu3 %v313_v8  ;;  %v304_v15 = vpop.xlane.xlu0 %303  ;;  %v346_v24 = vpop.xlane.xlu2 %345  ;;  %v2645_v8 = vld [vmem:[%s4598_s8 + $0x28] sm:$0xff]   ;;  %4746 = vst [vmem:[#allocation40_spill] sm:$0xff] %v3283_v13 }
 0x13e   :  { %v340_v29 = vpop.xlane.xlu1 %339  ;;  %v3276_v11 = vunpack.c.l.bf16 %v2645_v8  ;;  %4755 = vst [vmem:[#allocation49_spill] sm:$0xff] %v3421_v10 }
 0x13f   :  { %674 = vmatpush.msra.mxu2 %v310_v9  ;;  %2683 = vmatpush.msra.mxu3 %v310_v9  ;;  %v3269_v9 = vunpack.c.l.bf16 %v2662_v6 }
 0x140   :  { %4744 = vst [vmem:[#allocation38_spill] sm:$0xff] %v3276_v11 }
 0x141   :  { %675 = vmatpush.msra.mxu2 %v307_v7  ;;  %2684 = vmatpush.msra.mxu3 %v307_v7  ;;  %v3262_v7 = vunpack.c.h.bf16 %v2662_v6  ;;  %4743 = vst [vmem:[#allocation37_spill] sm:$0xff] %v3269_v9 }
 0x143   :  { %676 = vmatpush.msra.mxu2 %v304_v15  ;;  %2685 = vmatpush.msra.mxu3 %v304_v15  ;;  %4742 = vst [vmem:[#allocation36_spill] sm:$0xff] %v3262_v7  ;;  %v2646_v15 = vld [vmem:[%s4598_s8 + $0x30] sm:$0xff]  }
 0x144   :  { %v3313_v17 = vunpack.c.l.bf16 %v2646_v15  ;;  %v3328_v18 = vunpack.c.h.bf16 %v2646_v15  ;;  %v3425_v15 = vunpack.c.h.bf16 %v2665_v59 }
 0x145   :  { %677 = vmatpush.msra.mxu2 %v301_v14  ;;  %2686 = vmatpush.msra.mxu3 %v301_v14  ;;  %v352_v21 = vpop.xlane.xlu0 %351  ;;  %v337_v32 = vpop.xlane.xlu2 %336  ;;  %v3295_v14 = vunpack.c.h.bf16 %v2645_v8 }
 0x146   :  { %2345 = vmatmul.msk.f32.vlgmr.msra.gmra.mxu2 %vm356_vm2, %v3110_v19  ;;  %462 = vmatpush.msra.mxu0 %v352_v21  ;;  %4748 = vst [vmem:[#allocation42_spill] sm:$0xff] %v3313_v17 }
 0x147   :  { %2672 = vmatpush.msra.mxu1 %v352_v21  ;;  %2373 = vmatmul.msk.f32.vlgmr.msra.gmra.mxu3 %vm356_vm2, %v3112_v20  ;;  %4747 = vst [vmem:[#allocation41_spill] sm:$0xff] %v3295_v14  ;;  %v2647_v21 = vld [vmem:[%s4598_s8 + $0x38] sm:$0xff]  }
 0x148   :  { %880 = vmatpush.msra.mxu3 %v3080_v49  ;;  %463 = vmatpush.msra.mxu0 %v349_v23  ;;  %4749 = vst [vmem:[#allocation43_spill] sm:$0xff] %v3328_v18  ;;  %v3361_v28 = vunpack.c.h.bf16 %v2647_v21 }
 0x149   :  { %2673 = vmatpush.msra.mxu1 %v349_v23  ;;  %v2663_v23 = vld [vmem:[%s4599_s9 + $0x40] sm:$0xff]  }
 0x14a   :  { %881 = vmatpush.msra.mxu3 %v3071_v39  ;;  %464 = vmatpush.msra.mxu0 %v346_v24  ;;  %4751 = vst [vmem:[#allocation45_spill] sm:$0xff] %v3361_v28  ;;  %v288_v39 = vld [vmem:[%s4600_s7] sm:$0x3] }
 0x14b   :  { %2674 = vmatpush.msra.mxu1 %v346_v24  ;;  %v3348_v24 = vunpack.c.l.bf16 %v2647_v21 }
 0x14c   :  { %882 = vmatpush.msra.mxu3 %v3065_v33 }
 0x14d   :  { %v343_v26 = vpop.xlane.xlu0 %342  ;;  %4750 = vst [vmem:[#allocation44_spill] sm:$0xff] %v3348_v24 }
 0x14e   :  { %883 = vmatpush.msra.mxu3 %v3061_v27  ;;  %2346 = vmatmul.msk.f32.gmra.mxu2 %vm356_vm2, %v3120_v25 }
 0x14f   :  { %465 = vmatpush.msra.mxu0 %v343_v26  ;;  %2675 = vmatpush.msra.mxu1 %v343_v26  ;;  %v3352_v26 = vunpack.c.l.bf16 %v2663_v23 }
 0x150   :  { %884 = vmatpush.msra.mxu3 %v3057_v22 }
 0x151   :  { %466 = vmatpush.msra.mxu0 %v340_v29  ;;  %2676 = vmatpush.msra.mxu1 %v340_v29  ;;  %v3365_v29 = vunpack.c.h.bf16 %v2663_v23 }
 0x152   :  { %885 = vmatpush.msra.mxu3 %v3053_v16 }
 0x153   :  { %467 = vmatpush.msra.mxu0 %v337_v32  ;;  %2677 = vmatpush.msra.mxu1 %v337_v32  ;;  %v3377_v32 = vunpack.c.l.bf16 %v2648_v30  ;;  %v2650_v30 = vld [vmem:[%s4598_s8 + $0x50] sm:$0xff]  }
 0x154   :  { %886 = vmatpush.msra.mxu3 %v3085_v53  ;;  %v3443_v59 = vunpack.c.l.bf16 %v2650_v30 }
 0x155   :  { %v334_v38 = vpop.xlane.xlu0 %333  ;;  %2374 = vmatmul.msk.f32.gmra.mxu3 %vm356_vm2, %v3166_v44  ;;  %4752 = vst [vmem:[#allocation46_spill] sm:$0xff] %v3377_v32 }
 0x156   :  { %887 = vmatpush.msra.mxu3 %v3068_v35  ;;  %2347 = vmatmul.msk.f32.gmra.mxu2 %vm356_vm2, %v3137_v34  ;;  %4756 = vst [vmem:[#allocation50_spill] sm:$0xff] %v3443_v59 }
 0x157   :  { %468 = vmatpush.msra.mxu0 %v334_v38  ;;  %2678 = vmatpush.msra.mxu1 %v334_v38  ;;  %v3381_v38 = vunpack.c.l.bf16 %v2664_v31 }
 0x158   :  { %2317 = vmatmul.msk.f32.vlgmr.msra.gmra.mxu1 %vm356_vm2, %v3140_v36  ;;  %2313 = vmatmul.msk.f32.vlgmr.msra.gmra.mxu0 %vm356_vm2, %v3142_v37 }
 0x159   :  { %2693 = vmatpush.lsf.msrb.mxu0 %v3262_v7  ;;  %2721 = vmatpush.lsf.msrb.mxu3 %v3262_v7 }
 0x15b   :  { %2694 = vmatpush.lsf.msrb.mxu0 %v3269_v9  ;;  %2722 = vmatpush.lsf.msrb.mxu3 %v3269_v9 }
 0x15d   :  { %2375 = vmatmul.msk.f32.gmra.mxu3 %vm356_vm2, %v3191_v52  ;;  %2695 = vmatpush.lsf.msrb.mxu0 %v3278_v12 }
 0x15e   :  { %2348 = vmatmul.msk.f32.gmra.mxu2 %vm356_vm2, %v3151_v40  ;;  %2723 = vmatpush.lsf.msrb.mxu3 %v3278_v12 }
 0x15f   :  { %2696 = vmatpush.lsf.msrb.mxu0 %v3283_v13 }
 0x160   :  { %2318 = vmatmul.msk.f32.gmra.mxu1 %vm356_vm2, %v3153_v41  ;;  %2314 = vmatmul.msk.f32.gmra.mxu0 %vm356_vm2, %v3155_v42 }
 0x161   :  { %2697 = vmatpush.lsf.msrb.mxu0 %v3255_v5  ;;  %2724 = vmatpush.lsf.msrb.mxu3 %v3283_v13 }
 0x163   :  { %2698 = vmatpush.lsf.msrb.mxu0 %v3245_v3  ;;  %2725 = vmatpush.lsf.msrb.mxu3 %v3255_v5 }
 0x165   :  { %2376 = vmatmul.msk.f32.gmra.mxu3 %vm356_vm2, %v3210_v58  ;;  %2699 = vmatpush.lsf.msrb.mxu0 %v3229_v63 }
 0x166   :  { %2349 = vmatmul.msk.f32.gmra.mxu2 %vm356_vm2, %v3174_v47  ;;  %2726 = vmatpush.lsf.msrb.mxu3 %v3245_v3 }
 0x167   :  { %2700 = vmatpush.lsf.msrb.mxu0 %v3219_v61 }
 0x168   :  { %2319 = vmatmul.msk.f32.gmra.mxu1 %vm356_vm2, %v3178_v48  ;;  %2315 = vmatmul.msk.f32.gmra.mxu0 %vm356_vm2, %v3180_v50 }
 0x169   :  { %2701 = vmatpush.lsf.msrb.mxu0 %v3197_v55  ;;  %2727 = vmatpush.lsf.msrb.mxu3 %v3229_v63 }
 0x16b   :  { %2702 = vmatpush.lsf.msrb.mxu0 %v3178_v48  ;;  %2728 = vmatpush.lsf.msrb.mxu3 %v3219_v61 }
 0x16d   :  { %2377 = vmatmul.msk.f32.vlgmr.msra.gmra.mxu3 %vm356_vm2, %v3110_v19  ;;  %2703 = vmatpush.lsf.msrb.mxu0 %v3153_v41 }
 0x16e   :  { %2350 = vmatmul.msk.f32.gmra.mxu2 %vm356_vm2, %v3193_v54  ;;  %2729 = vmatpush.lsf.msrb.mxu3 %v3197_v55 }
 0x16f   :  { %2704 = vmatpush.lsf.msrb.mxu0 %v3140_v36 }
 0x170   :  { %2320 = vmatmul.msk.f32.gmra.mxu1 %vm356_vm2, %v3197_v55  ;;  %2316 = vmatmul.msk.f32.gmra.mxu0 %vm356_vm2, %v3199_v56  ;;  %v2651_v55 = vld [vmem:[%s4598_s8 + $0x58] sm:$0xff]  }
 0x171   :  { %2705 = vmatpush.lsf.msrb.mxu0 %v3199_v56  ;;  %2730 = vmatpush.lsf.msrb.mxu3 %v3178_v48  ;;  %v3481_v48 = vunpack.c.l.bf16 %v2651_v55 }
 0x173   :  { %2706 = vmatpush.lsf.msrb.mxu0 %v3180_v50  ;;  %2731 = vmatpush.lsf.msrb.mxu3 %v3153_v41  ;;  %4758 = vst [vmem:[#allocation52_spill] sm:$0xff] %v3481_v48 }
 0x175   :  { %2378 = vmatmul.msk.f32.gmra.mxu3 %vm356_vm2, %v3120_v25  ;;  %2707 = vmatpush.lsf.msrb.mxu0 %v3155_v42 }
 0x176   :  { %2351 = vmatmul.msk.f32.gmra.mxu2 %vm356_vm2, %v3215_v60  ;;  %2732 = vmatpush.lsf.msrb.mxu3 %v3140_v36 }
 0x177   :  { %2708 = vmatpush.lsf.msrb.mxu0 %v3142_v37 }
 0x178   :  { %2321 = vmatmul.msk.f32.gmra.mxu1 %vm356_vm2, %v3219_v61  ;;  %2709 = vllmr.8.mxu0 }
 0x179   :  { %2733 = vmatpush.lsf.msrb.mxu3 %v3199_v56 }
 0x17b   :  { %2734 = vmatpush.lsf.msrb.mxu3 %v3180_v50 }
 0x17d   :  { %2379 = vmatmul.msk.f32.gmra.mxu3 %vm356_vm2, %v3137_v34 }
 0x17e   :  { %2352 = vmatmul.msk.f32.gmra.mxu2 %vm356_vm2, %v3225_v62  ;;  %2735 = vmatpush.lsf.msrb.mxu3 %v3155_v42  ;;  %v3497_v42 = vunpack.c.h.bf16 %v2651_v55 }
 0x180   :  { %2322 = vmatmul.msk.f32.gmra.mxu1 %vm356_vm2, %v3229_v63  ;;  %2736 = vmatpush.lsf.msrb.mxu3 %v3142_v37  ;;  %4759 = vst [vmem:[#allocation53_spill] sm:$0xff] %v3497_v42 }
 0x185   :  { %2380 = vmatmul.msk.f32.gmra.mxu3 %vm356_vm2, %v3151_v40 }
 0x186   :  { %2353 = vmatmul.msk.f32.gmra.mxu2 %vm356_vm2, %v3241_v2 }
 0x188   :  { %2323 = vmatmul.msk.f32.gmra.mxu1 %vm356_vm2, %v3245_v3  ;;  %v3463_v3 = vunpack.c.h.bf16 %v2666_v51 }
 0x18d   :  { %2381 = vmatmul.msk.f32.gmra.mxu3 %vm356_vm2, %v3174_v47  ;;  %v2946_v47 = vmov 0  }
 0x18e   :  { %2354 = vmatmul.msk.f32.gmra.mxu2 %vm356_vm2, %v3251_v4  ;;  %2749 = vset.pattern.permute.xlu1 %v2946_v47 }
 0x18f   :  { %2748 = vset.pattern.permute.xlu2 %v2946_v47  ;;  %2747 = vset.pattern.permute.xlu0 %v2946_v47 }
 0x190   :  { %2324 = vmatmul.msk.f32.gmra.mxu1 %vm356_vm2, %v3255_v5  ;;  %v3459_v5 = vunpack.c.h.bf16 %v2650_v30 }
 0x192   :  { %4757 = vst [vmem:[#allocation51_spill] sm:$0xff] %v3459_v5 }
 0x195   :  { %2382 = vmatmul.msk.f32.gmra.mxu3 %vm356_vm2, %v3193_v54  ;;  %v2653_v54 = vld [vmem:[%s4598_s8 + $0x68] sm:$0xff]  }
 0x196   :  { %2355 = vmatmul.msk.f32.gmra.mxu2 %vm356_vm2, %v3276_v11  ;;  %v3559_v19 = vunpack.c.h.bf16 %v2653_v54 }
 0x198   :  { %2325 = vmatmul.msk.f32.gmra.mxu1 %vm356_vm2, %v3283_v13  ;;  %4767 = vst [vmem:[#allocation61_spill] sm:$0xff] %v3559_v19 }
 0x19d   :  { %2383 = vmatmul.msk.f32.gmra.mxu3 %vm356_vm2, %v3215_v60 }
 0x19e   :  { %2356 = vmatmul.msk.f32.gmra.mxu2 %vm356_vm2, %v3295_v14 }
 0x1a0   :  { %2326 = vmatmul.msk.f32.gmra.mxu1 %vm356_vm2, %v3278_v12 }
 0x1a5   :  { %2384 = vmatmul.msk.f32.gmra.mxu3 %vm356_vm2, %v3225_v62 }
 0x1a6   :  { %2357 = vmatmul.msk.f32.gmra.mxu2 %vm356_vm2, %v3313_v17 }
 0x1a8   :  { %2327 = vmatmul.msk.f32.gmra.mxu1 %vm356_vm2, %v3269_v9 }
 0x1ac   :  { %2737 = vllmr.8.mxu3 }
 0x1ad   :  { %2385 = vmatmul.msk.f32.gmra.mxu3 %vm356_vm2, %v3241_v2 }
 0x1ae   :  { %2358 = vmatmul.msk.f32.gmra.mxu2 %vm356_vm2, %v3328_v18 }
 0x1b0   :  { %2328 = vmatmul.msk.f32.gmra.mxu1 %vm356_vm2, %v3262_v7  ;;  %v3447_v7 = vunpack.c.l.bf16 %v2666_v51  ;;  %v2667_v51 = vld [vmem:[%s4599_s9 + $0x60] sm:$0xff]  }
 0x1b1   :  { %v3485_v41 = vunpack.c.l.bf16 %v2667_v51 }
 0x1b5   :  { %2386 = vmatmul.msk.f32.gmra.mxu3 %vm356_vm2, %v3251_v4 }
 0x1b6   :  { %2359 = vmatmul.msk.f32.gmra.mxu2 %vm356_vm2, %v3348_v24 }
 0x1b8   :  { %2329 = vmatmul.msk.f32.gmra.mxu1 %vm356_vm2, %v3352_v26 }
 0x1bd   :  { %2387 = vmatmul.msk.f32.gmra.mxu3 %vm356_vm2, %v3276_v11 }
 0x1be   :  { %2360 = vmatmul.msk.f32.gmra.mxu2 %vm356_vm2, %v3361_v28 }
 0x1c0   :  { %2330 = vmatmul.msk.f32.gmra.mxu1 %vm356_vm2, %v3365_v29 }
 0x1c5   :  { %2388 = vmatmul.msk.f32.gmra.mxu3 %vm356_vm2, %v3295_v14 }
 0x1c6   :  { %2361 = vmatmul.msk.f32.gmra.mxu2 %vm356_vm2, %v3377_v32 }
 0x1c8   :  { %2331 = vmatmul.msk.f32.gmra.mxu1 %vm356_vm2, %v3381_v38 }
 0x1c9   :  { %v3387_v43 = vpop.f32.mrf.mxu2 }
 0x1ca   :  { %v3431_v23 = vpop.f32.mrf.mxu3 }
 0x1cd   :  { %2389 = vmatmul.msk.f32.gmra.mxu3 %vm356_vm2, %v3313_v17 }
 0x1ce   :  { %2362 = vmatmul.msk.f32.gmra.mxu2 %vm356_vm2, %v3389_v45 }
 0x1d0   :  { %2332 = vmatmul.msk.f32.gmra.mxu1 %vm356_vm2, %v3393_v46 }
 0x1d1   :  { %v3402_v57 = vpop.f32.mrf.mxu2 }
 0x1d5   :  { %v3413_v6 = vpop.f32.mrf.mxu1  ;;  %2390 = vmatmul.msk.f32.gmra.mxu3 %vm356_vm2, %v3328_v18  ;;  %v2652_v18 = vld [vmem:[%s4598_s8 + $0x60] sm:$0xff]   ;;  %v3561_v35 = vpop.f32.mrf.mxu0 }
 0x1d6   :  { %2363 = vmatmul.msk.f32.gmra.mxu2 %vm356_vm2, %v3407_v0  ;;  %v3529_v2 = vunpack.c.h.bf16 %v2652_v18 }
 0x1d8   :  { %2333 = vmatmul.msk.f32.gmra.mxu1 %vm356_vm2, %v3411_v1  ;;  %v3453_v12 = vpop.f32.mrf.mxu3  ;;  %4763 = vst [vmem:[#allocation57_spill] sm:$0xff] %v3529_v2 }
 0x1d9   :  { %v3419_v8 = vpop.f32.mrf.mxu2 }
 0x1dd   :  { %v3427_v21 = vpop.f32.mrf.mxu1  ;;  %2391 = vmatmul.msk.f32.gmra.mxu3 %vm356_vm2, %v3348_v24 }
 0x1de   :  { %2364 = vmatmul.msk.f32.gmra.mxu2 %vm356_vm2, %v3421_v10 }
 0x1e0   :  { %2334 = vmatmul.msk.f32.gmra.mxu1 %vm356_vm2, %v3425_v15  ;;  %v3469_v61 = vpop.f32.mrf.mxu3 }
 0x1e1   :  { %v3438_v31 = vpop.f32.mrf.mxu2 }
 0x1e5   :  { %v3449_v9 = vpop.f32.mrf.mxu1  ;;  %2392 = vmatmul.msk.f32.gmra.mxu3 %vm356_vm2, %v3361_v28  ;;  %v3501_v28 = vunpack.c.h.bf16 %v2667_v51  ;;  %v3515_v51 = vunpack.c.l.bf16 %v2652_v18 }
 0x1e6   :  { %2365 = vmatmul.msk.f32.gmra.mxu2 %vm356_vm2, %v3443_v59 }
 0x1e7   :  { %4760 = vst [vmem:[#allocation54_spill] sm:$0xff] %v3501_v28 }
 0x1e8   :  { %2335 = vmatmul.msk.f32.gmra.mxu1 %vm356_vm2, %v3447_v7  ;;  %v3491_v56 = vpop.f32.mrf.mxu3  ;;  %4761 = vst [vmem:[#allocation55_spill] sm:$0xff] %v3515_v51 }
 0x1e9   :  { %v3457_v13 = vpop.f32.mrf.mxu2 }
 0x1ed   :  { %v3465_v63 = vpop.f32.mrf.mxu1  ;;  %2393 = vmatmul.msk.f32.gmra.mxu3 %vm356_vm2, %v3377_v32  ;;  %v2668_v32 = vld [vmem:[%s4599_s9 + $0x68] sm:$0xff]  }
 0x1ee   :  { %2366 = vmatmul.msk.f32.gmra.mxu2 %vm356_vm2, %v3459_v5  ;;  %v3519_v17 = vunpack.c.l.bf16 %v2668_v32  ;;  %v3533_v62 = vunpack.c.h.bf16 %v2668_v32  ;;  %v2669_v32 = vld [vmem:[%s4599_s9 + $0x70] sm:$0xff]  }
 0x1ef   :  { %v3551_v40 = vunpack.c.l.bf16 %v2669_v32 }
 0x1f0   :  { %2336 = vmatmul.msk.f32.gmra.mxu1 %vm356_vm2, %v3463_v3  ;;  %v3505_v24 = vpop.f32.mrf.mxu3  ;;  %4762 = vst [vmem:[#allocation56_spill] sm:$0xff] %v3519_v17 }
 0x1f1   :  { %v3476_v30 = vpop.f32.mrf.mxu2  ;;  %4764 = vst [vmem:[#allocation58_spill] sm:$0xff] %v3533_v62 }
 0x1f2   :  { %4766 = vst [vmem:[#allocation60_spill] sm:$0xff] %v3551_v40 }
 0x1f5   :  { %v3487_v36 = vpop.f32.mrf.mxu1  ;;  %2394 = vmatmul.msk.f32.gmra.mxu3 %vm356_vm2, %v3389_v45 }
 0x1f6   :  { %2367 = vmatmul.msk.f32.gmra.mxu2 %vm356_vm2, %v3481_v48 }
 0x1f8   :  { %2337 = vmatmul.msk.f32.gmra.mxu1 %vm356_vm2, %v3485_v41  ;;  %v3523_v11 = vpop.f32.mrf.mxu3 }
 0x1f9   :  { %v3495_v50 = vpop.f32.mrf.mxu2 }
 0x1fd   :  { %v497_v37 = vpop.f32.mrf.mxu1  ;;  %2395 = vmatmul.msk.f32.gmra.mxu3 %vm356_vm2, %v3407_v0  ;;  %v3547_v0 = vunpack.c.l.bf16 %v2653_v54 }
 0x1fe   :  { %2368 = vmatmul.msk.f32.gmra.mxu2 %vm356_vm2, %v3497_v42 }
 0x1ff   :  { %4765 = vst [vmem:[#allocation59_spill] sm:$0xff] %v3547_v0 }
 0x200   :  { %2338 = vmatmul.msk.f32.gmra.mxu1 %vm356_vm2, %v3501_v28  ;;  %v3537_v60 = vpop.f32.mrf.mxu3 }
 0x201   :  { %v700_v55 = vpop.f32.mrf.mxu2 }
 0x205   :  { %v500_v14 = vpop.f32.mrf.mxu1  ;;  %2396 = vmatmul.msk.f32.gmra.mxu3 %vm356_vm2, %v3421_v10  ;;  %v3565_v10 = vunpack.c.h.bf16 %v2669_v32  ;;  %v3579_v32 = vperm.slane %v288_v39, 0 }
 0x206   :  { %2369 = vmatmul.msk.f32.gmra.mxu2 %vm356_vm2, %v3515_v51 }
 0x207   :  { %4768 = vst [vmem:[#allocation62_spill] sm:$0xff] %v3565_v10 }
 0x208   :  { %2339 = vmatmul.msk.f32.gmra.mxu1 %vm356_vm2, %v3519_v17  ;;  %v3555_v25 = vpop.f32.mrf.mxu3 }
 0x209   :  { %v3527_v4 = vpop.f32.mrf.mxu2 }
 0x20d   :  { %v503_v45 = vpop.f32.mrf.mxu1  ;;  %2397 = vmatmul.msk.f32.gmra.mxu3 %vm356_vm2, %v3443_v59  ;;  %v2670_v59 = vld [vmem:[%s4599_s9 + $0x78] sm:$0xff]  }
 0x20e   :  { %2370 = vmatmul.msk.f32.gmra.mxu2 %vm356_vm2, %v3529_v2  ;;  %v3584_v16 = vunpack.c.l.bf16 %v2670_v59 }
 0x210   :  { %2340 = vmatmul.msk.f32.gmra.mxu1 %vm356_vm2, %v3533_v62  ;;  %v3569_v49 = vpop.f32.mrf.mxu3  ;;  %4769 = vst [vmem:[#allocation63_spill] sm:$0xff] %v3584_v16 }
 0x211   :  { %v706_v18 = vpop.f32.mrf.mxu2 }
 0x212   :  { %v707_v27 = vadd.f32 %v706_v18, %v497_v37  ;;  %v265_v37 = vld [vmem:[%s4601_s10 + $0x58] sm:$0xff] }
 0x214   :  { %v785_v17 = vadd.f32 %v3579_v32, %v707_v27  ;;  %v3598_v27 = vunpack.c.h.bf16 %v2670_v59 }
 0x215   :  { %v506_v34 = vpop.f32.mrf.mxu1  ;;  %2398 = vmatmul.msk.f32.gmra.mxu3 %vm356_vm2, %v3459_v5 }
 0x216   :  { %2371 = vmatmul.msk.f32.gmra.mxu2 %vm356_vm2, %v3547_v0  ;;  %4770 = vst [vmem:[#allocation64_spill] sm:$0xff] %v3598_v27 }
 0x218   :  { %2341 = vmatmul.msk.f32.gmra.mxu1 %vm356_vm2, %v3551_v40  ;;  %v473_v40 = vpop.f32.mrf.mxu0 }
 0x219   :  { %v709_v47 = vpop.f32.mrf.mxu2 }
 0x21d   :  { %v509_v53 = vpop.f32.mrf.mxu1  ;;  %2399 = vmatmul.msk.f32.gmra.mxu3 %vm356_vm2, %v3481_v48 }
 0x21e   :  { %2372 = vmatmul.msk.f32.gmra.mxu2 %vm356_vm2, %v3559_v19 }
 0x220   :  { %2342 = vmatmul.msk.f32.gmra.mxu1 %vm356_vm2, %v3565_v10  ;;  %v3586_v10 = vpop.f32.mrf.mxu3 }
 0x221   :  { %v712_v54 = vpop.f32.mrf.mxu2 }
 0x222   :  { %v713_v33 = vadd.f32 %v712_v54, %v503_v45 }
 0x224   :  { %v787_v22 = vadd.f32 %v3579_v32, %v713_v33  ;;  %v701_v33 = vadd.f32 %v700_v55, %v3465_v63 }
 0x225   :  { %v512_v62 = vpop.f32.mrf.mxu1  ;;  %2400 = vmatmul.msk.f32.gmra.mxu3 %vm356_vm2, %v3497_v42 }
 0x226   :  { %2752 = vtanh.f32 %v787_v22  ;;  %v710_v22 = vadd.f32 %v709_v47, %v500_v14  ;;  %v783_v63 = vadd.f32 %v3579_v32, %v701_v33  ;;  %v263_v47 = vld [vmem:[%s4601_s10 + $0x48] sm:$0xff] }
 0x227   :  { %2754 = vtanh.f32 %v785_v17 }
 0x228   :  { %2343 = vmatmul.msk.f32.gmra.mxu1 %vm356_vm2, %v3584_v16  ;;  %v786_v55 = vadd.f32 %v3579_v32, %v710_v22 }
 0x229   :  { %v715_v39 = vpop.f32.mrf.mxu2 }
 0x22a   :  { %v716_v45 = vadd.f32 %v715_v39, %v506_v34  ;;  %v3602_v34 = vpop.f32.mrf.mxu3  ;;  %v3604_v39 = vpop.f32.mrf.mxu0 }
 0x22c   :  { %v2753_v18 = vpop.eup %2752  ;;  %v788_v54 = vadd.f32 %v3579_v32, %v716_v45  ;;  %v266_v45 = vld [vmem:[%s4601_s10 + $0x60] sm:$0xff] }
 0x22d   :  { %v3600_v5 = vpop.f32.mrf.mxu1  ;;  %v851_v16 = vmul.f32 %v2753_v18, %v265_v37  ;;  %v2755_v17 = vpop.eup %2754  ;;  %v692_v37 = vadd.f32 %v3457_v13, %v3413_v6  ;;  %2401 = vmatmul.msk.f32.gmra.mxu3 %vm356_vm2, %v3515_v51 }
 0x22e   :  { %2756 = vtanh.f32 %v788_v54  ;;  %v849_v22 = vmul.f32 %v2755_v17, %v263_v47  ;;  %v267_v17 = vld [vmem:[%s4601_s10 + $0x68] sm:$0xff]  ;;  %v683_v47 = vadd.f32 %v3402_v57, %v473_v40 }
 0x22f   :  { %1042 = vperm.xlu1 %2749, %v851_v16   ;;  %2758 = vtanh.f32 %v783_v63  ;;  %v780_v63 = vadd.f32 %v3579_v32, %v692_v37 }
 0x230   :  { %2344 = vmatmul.msk.f32.gmra.mxu1 %vm356_vm2, %v3598_v27  ;;  %2760 = vtanh.f32 %v786_v55  ;;  %v777_v57 = vadd.f32 %v3579_v32, %v683_v47  ;;  %v282_v27 = vld [vmem:[%s4601_s10 + $0xe0] sm:$0xff] }
 0x231   :  { %v718_v14 = vpop.f32.mrf.mxu2 }
 0x232   :  { %v719_v59 = vadd.f32 %v718_v14, %v509_v53  ;;  %v698_v53 = vadd.f32 %v3495_v50, %v3449_v9  ;;  %v3625_v14 = vpop.f32.mrf.mxu3  ;;  %v479_v6 = vpop.f32.mrf.mxu0  ;;  %v261_v50 = vld [vmem:[%s4601_s10 + $0x38] sm:$0xff]  ;;  %v264_v9 = vld [vmem:[%s4601_s10 + $0x50] sm:$0xff] }
 0x234   :  { %v2757_v16 = vpop.eup %2756  ;;  %v789_v33 = vadd.f32 %v3579_v32, %v719_v59  ;;  %v782_v13 = vadd.f32 %v3579_v32, %v698_v53 }
 0x235   :  { %v3623_v18 = vpop.f32.mrf.mxu1  ;;  %v852_v54 = vmul.f32 %v2757_v16, %v266_v45  ;;  %v2759_v42 = vpop.eup %2758  ;;  %v704_v16 = vadd.f32 %v3527_v4, %v3487_v36  ;;  %2402 = vmatmul.msk.f32.gmra.mxu3 %vm356_vm2, %v3529_v2 }
 0x236   :  { %2762 = vtanh.f32 %v789_v33  ;;  %v2761_v59 = vpop.eup %2760  ;;  %v847_v53 = vmul.f32 %v2759_v42, %v261_v50  ;;  %v258_v42 = vld [vmem:[%s4601_s10 + $0x20] sm:$0xff] }
 0x237   :  { %1032 = vperm.xlu1 %2749, %v849_v22   ;;  %1047 = vperm.xlu2 %2748, %v852_v54   ;;  %2764 = vtanh.f32 %v780_v63  ;;  %v850_v22 = vmul.f32 %v2761_v59, %v264_v9  ;;  %v268_v63 = vld [vmem:[%s4601_s10 + $0x70] sm:$0xff]  ;;  %v680_v9 = vadd.f32 %v3387_v43, %v3561_v35  ;;  %v262_v43 = vld [vmem:[%s4601_s10 + $0x40] sm:$0xff] }
 0x238   :  { %2766 = vtanh.f32 %v782_v13 }
 0x239   :  { %v721_v55 = vpop.f32.mrf.mxu2 }
 0x23a   :  { %v722_v48 = vadd.f32 %v721_v55, %v512_v62  ;;  %v689_v62 = vadd.f32 %v3438_v31, %v479_v6  ;;  %v3647_v40 = vpop.f32.mrf.mxu3  ;;  %v784_v31 = vadd.f32 %v3579_v32, %v704_v16  ;;  %v695_v6 = vadd.f32 %v3476_v30, %v3427_v21  ;;  %v260_v55 = vld [vmem:[%s4601_s10 + $0x30] sm:$0xff] }
 0x23c   :  { %v2763_v45 = vpop.eup %2762  ;;  %v790_v37 = vadd.f32 %v3579_v32, %v722_v48  ;;  %v779_v36 = vadd.f32 %v3579_v32, %v689_v62  ;;  %v781_v62 = vadd.f32 %v3579_v32, %v695_v6 }
 0x23d   :  { %v3645_v33 = vpop.f32.mrf.mxu1  ;;  %v853_v54 = vmul.f32 %v2763_v45, %v267_v17  ;;  %v2765_v48 = vpop.eup %2764  ;;  %2403 = vmatmul.msk.f32.gmra.mxu3 %vm356_vm2, %v3547_v0 }
 0x23e   :  { %2768 = vtanh.f32 %v790_v37  ;;  %v2767_v13 = vpop.eup %2766  ;;  %v844_v47 = vmul.f32 %v2765_v48, %v258_v42 }
 0x23f   :  { %1022 = vperm.xlu1 %2749, %v847_v53   ;;  %1037 = vperm.xlu2 %2748, %v850_v22   ;;  %2770 = vtanh.f32 %v777_v57  ;;  %v846_v30 = vmul.f32 %v2767_v13, %v260_v55  ;;  %v255_v22 = vld [vmem:[%s4601_s10 + $0x8] sm:$0xff]  ;;  %v257_v57 = vld [vmem:[%s4601_s10 + $0x18] sm:$0xff] }
 0x240   :  { %1052 = vperm.xlu0 %2747, %v853_v54   ;;  %2772 = vtanh.f32 %v784_v31  ;;  %v686_v31 = vadd.f32 %v3419_v8, %v3604_v39  ;;  %v259_v8 = vld [vmem:[%s4601_s10 + $0x28] sm:$0xff]  ;;  %v269_v39 = vld [vmem:[%s4601_s10 + $0x78] sm:$0xff] }
 0x241   :  { %v724_v4 = vpop.f32.mrf.mxu2  ;;  %2774 = vtanh.f32 %v779_v36 }
 0x242   :  { %v725_v50 = vadd.f32 %v724_v4, %v3600_v5  ;;  %v3670_v45 = vpop.f32.mrf.mxu3  ;;  %v776_v5 = vadd.f32 %v3579_v32, %v680_v9  ;;  %2776 = vtanh.f32 %v781_v62  ;;  %v778_v13 = vadd.f32 %v3579_v32, %v686_v31  ;;  %v3706_v9 = vld [vmem:[%s4601_s10] sm:$0xff] }
 0x243   :  { %4771 = vst [vmem:[#allocation65_spill] sm:$0xff] %v3706_v9 }
 0x244   :  { %v2769_v59 = vpop.eup %2768  ;;  %v791_v16 = vadd.f32 %v3579_v32, %v725_v50 }
 0x245   :  { %v3668_v17 = vpop.f32.mrf.mxu1  ;;  %v854_v21 = vmul.f32 %v2769_v59, %v268_v63  ;;  %v2771_v37 = vpop.eup %2770  ;;  %2404 = vmatmul.msk.f32.gmra.mxu3 %vm356_vm2, %v3559_v19 }
 0x246   :  { %v2773_v35 = vpop.eup %2772  ;;  %2778 = vtanh.f32 %v791_v16  ;;  %v841_v48 = vmul.f32 %v2771_v37, %v255_v22 }
 0x247   :  { %1007 = vperm.xlu1 %2749, %v844_v47   ;;  %1057 = vperm.xlu2 %2748, %v854_v21   ;;  %v2775_v54 = vpop.eup %2774  ;;  %2780 = vtanh.f32 %v776_v5  ;;  %v848_v4 = vmul.f32 %v2773_v35, %v262_v43  ;;  %v256_v35 = vld [vmem:[%s4601_s10 + $0x10] sm:$0xff] }
 0x248   :  { %1017 = vperm.xlu0 %2747, %v846_v30   ;;  %v843_v42 = vmul.f32 %v2775_v54, %v257_v57  ;;  %v2777_v6 = vpop.eup %2776  ;;  %2782 = vtanh.f32 %v778_v13 }
 0x249   :  { %v3675_v53 = vpop.f32.mrf.mxu2  ;;  %v845_v21 = vmul.f32 %v2777_v6, %v259_v8 }
 0x24a   :  { %v3692_v63 = vpop.f32.mrf.mxu3 }
 0x24c   :  { %v2779_v59 = vpop.eup %2778 }
 0x24d   :  { %v3690_v36 = vpop.f32.mrf.mxu1  ;;  %v2781_v50 = vpop.eup %2780  ;;  %v855_v30 = vmul.f32 %v2779_v59, %v269_v39  ;;  %2405 = vmatmul.msk.f32.gmra.mxu3 %vm356_vm2, %v3112_v20 }
 0x24e   :  { %v840_v62 = vmul.f32 %v2781_v50, %v3706_v9  ;;  %v2783_v5 = vpop.eup %2782 }
 0x24f   :  { %1027 = vperm.xlu2 %2748, %v848_v4   ;;  %992 = vperm.xlu1 %2749, %v841_v48   ;;  %v842_v22 = vmul.f32 %v2783_v5, %v256_v35 }
 0x250   :  { %1002 = vperm.xlu0 %2747, %v843_v42  }
 0x251   :  { %v3695_v55 = vpop.f32.mrf.mxu2 }
 0x252   :  { %v3713_v16 = vpop.f32.mrf.mxu3 }
 0x255   :  { %v3710_v47 = vpop.f32.mrf.mxu1  ;;  %2406 = vmatmul.msk.f32.gmra.mxu3 %vm356_vm2, %v3166_v44 }
 0x257   :  { %1012 = vperm.xlu2 %2748, %v845_v21   ;;  %1062 = vperm.xlu1 %2749, %v855_v30  }
 0x258   :  { %987 = vperm.xlu0 %2747, %v840_v62  }
 0x259   :  { %v3715_v37 = vpop.f32.mrf.mxu2 }
 0x25a   :  { %v3724_v54 = vpop.f32.mrf.mxu3 }
 0x25d   :  { %v3722_v43 = vpop.f32.mrf.mxu1  ;;  %2407 = vmatmul.msk.f32.gmra.mxu3 %vm356_vm2, %v3191_v52 }
 0x25f   :  { %997 = vperm.xlu2 %2748, %v842_v22  }
 0x261   :  { %v3726_v57 = vpop.f32.mrf.mxu2 }
 0x262   :  { %v3732_v4 = vpop.f32.mrf.mxu3 }
 0x265   :  { %v3730_v31 = vpop.f32.mrf.mxu1  ;;  %2408 = vmatmul.msk.f32.gmra.mxu3 %vm356_vm2, %v3210_v58 }
 0x269   :  { %v739_v48 = vpop.f32.mrf.mxu2 }
 0x26a   :  { %v3736_v13 = vpop.f32.mrf.mxu3 }
 0x26d   :  { %v539_v42 = vpop.f32.mrf.mxu1 }
 0x271   :  { %v742_v6 = vpop.f32.mrf.mxu2 }
 0x272   :  { %v3740_v8 = vpop.f32.mrf.mxu3 }
 0x275   :  { %v542_v59 = vpop.f32.mrf.mxu1 }
 0x279   :  { %v3742_v39 = vpop.f32.mrf.mxu2 }
 0x27a   :  { %v3744_v21 = vpop.f32.mrf.mxu3 }
 0x27b   :  { %4772 = vst [vmem:[#allocation66_spill] sm:$0xff] %v3744_v21 }
 0x27d   :  { %v545_v50 = vpop.f32.mrf.mxu1 }
 0x281   :  { %v748_v30 = vpop.f32.mrf.mxu2 }
 0x282   :  { %v3746_v5 = vpop.f32.mrf.mxu3 }
 0x283   :  { %4773 = vst [vmem:[#allocation67_spill] sm:$0xff] %v3746_v5 }
 0x285   :  { %v548_v62 = vpop.f32.mrf.mxu1 }
 0x289   :  { %v751_v35 = vpop.f32.mrf.mxu2 }
 0x28a   :  { %v3750_v52 = vpop.f32.mrf.mxu3 }
 0x28b   :  { %4774 = vst [vmem:[#allocation68_spill] sm:$0xff] %v3750_v52 }
 0x28d   :  { %v3748_v22 = vpop.f32.mrf.mxu1 }
 0x291   :  { %v754_v44 = vpop.f32.mrf.mxu2 }
 0x292   :  { %v3754_v0 = vpop.f32.mrf.mxu3 }
 0x293   :  { %4775 = vst [vmem:[#allocation69_spill] sm:$0xff] %v3754_v0 }
 0x295   :  { %v554_v20 = vpop.f32.mrf.mxu1 }
 0x296   :  { %v764_v58 = vadd.f32 %v3431_v23, %v554_v20 }
 0x298   :  { %v804_v19 = vadd.f32 %v3579_v32, %v764_v58 }
 0x299   :  { %v757_v2 = vpop.f32.mrf.mxu2 }
 0x29a   :  { %2784 = vtanh.f32 %v804_v19  ;;  %v758_v5 = vadd.f32 %v757_v2, %v548_v62  ;;  %v3764_v23 = vpop.f32.mrf.mxu3  ;;  %v752_v2 = vadd.f32 %v751_v35, %v542_v59  ;;  %v749_v62 = vadd.f32 %v748_v30, %v539_v42  ;;  %v284_v59 = vld [vmem:[%s4601_s10 + $0xf0] sm:$0xff] }
 0x29b   :  { %4776 = vst [vmem:[#allocation70_spill] sm:$0xff] %v3764_v23  ;;  %v743_v42 = vadd.f32 %v742_v6, %v3722_v43 }
 0x29c   :  { %v802_v19 = vadd.f32 %v3579_v32, %v758_v5  ;;  %v799_v5 = vadd.f32 %v3579_v32, %v749_v62 }
 0x29d   :  { %v557_v51 = vpop.f32.mrf.mxu1  ;;  %v797_v62 = vadd.f32 %v3579_v32, %v743_v42 }
 0x29e   :  { %v767_v9 = vadd.f32 %v3453_v12, %v557_v51  ;;  %v283_v51 = vld [vmem:[%s4601_s10 + $0xe8] sm:$0xff] }
 0x2a0   :  { %v2785_v21 = vpop.eup %2784  ;;  %v805_v52 = vadd.f32 %v3579_v32, %v767_v9 }
 0x2a1   :  { %v3761_v28 = vpop.permute.xlu1 %1042  ;;  %v868_v20 = vmul.f32 %v2785_v21, %v282_v27  ;;  %v800_v21 = vadd.f32 %v3579_v32, %v752_v2 }
 0x2a2   :  { %2786 = vtanh.f32 %v805_v52  ;;  %v3785_v30 = vpop.f32.mrf.mxu3 }
 0x2a3   :  { %1127 = vperm.xlu2 %2748, %v868_v20   ;;  %2788 = vtanh.f32 %v802_v19  ;;  %v755_v19 = vadd.f32 %v754_v44, %v545_v50  ;;  %v278_v44 = vld [vmem:[%s4601_s10 + $0xc0] sm:$0xff]  ;;  %v734_v50 = vadd.f32 %v3715_v37, %v3668_v17 }
 0x2a5   :  { %v560_v58 = vpop.f32.mrf.mxu1  ;;  %v801_v43 = vadd.f32 %v3579_v32, %v755_v19 }
 0x2a6   :  { %v770_v12 = vadd.f32 %v3469_v61, %v560_v58  ;;  %v3775_v58 = vpop.permute.xlu2 %1047 }
 0x2a8   :  { %v2787_v0 = vpop.eup %2786  ;;  %v806_v9 = vadd.f32 %v3579_v32, %v770_v12 }
 0x2a9   :  { %v3771_v27 = vpop.permute.xlu1 %1032  ;;  %v869_v52 = vmul.f32 %v2787_v0, %v283_v51  ;;  %v2789_v20 = vpop.eup %2788  ;;  %v280_v0 = vld [vmem:[%s4601_s10 + $0xd0] sm:$0xff]  ;;  %v740_v51 = vadd.f32 %v739_v48, %v3710_v47  ;;  %v285_v47 = vld [vmem:[%s4601_s10 + $0xf8] sm:$0xff] }
 0x2aa   :  { %2790 = vtanh.f32 %v806_v9  ;;  %v866_v9 = vmul.f32 %v2789_v20, %v280_v0  ;;  %v731_v20 = vadd.f32 %v3695_v55, %v3645_v33  ;;  %v3813_v37 = vpop.f32.mrf.mxu3  ;;  %v275_v55 = vld [vmem:[%s4601_s10 + $0xa8] sm:$0xff] }
 0x2ab   :  { %1132 = vperm.xlu0 %2747, %v869_v52   ;;  %2792 = vtanh.f32 %v800_v21  ;;  %v796_v6 = vadd.f32 %v3579_v32, %v740_v51  ;;  %v279_v51 = vld [vmem:[%s4601_s10 + $0xc8] sm:$0xff] }
 0x2ac   :  { %2794 = vtanh.f32 %v799_v5  ;;  %v746_v5 = vadd.f32 %v3742_v39, %v3730_v31  ;;  %v793_v19 = vadd.f32 %v3579_v32, %v731_v20 }
 0x2ad   :  { %v563_v61 = vpop.f32.mrf.mxu1 }
 0x2ae   :  { %v773_v23 = vadd.f32 %v3491_v56, %v563_v61  ;;  %v3807_v61 = vpop.permute.xlu2 %1037  ;;  %v798_v31 = vadd.f32 %v3579_v32, %v746_v5  ;;  %v276_v5 = vld [vmem:[%s4601_s10 + $0xb0] sm:$0xff] }
 0x2b0   :  { %v2791_v35 = vpop.eup %2790  ;;  %v807_v12 = vadd.f32 %v3579_v32, %v773_v23  ;;  %v277_v23 = vld [vmem:[%s4601_s10 + $0xb8] sm:$0xff] }
 0x2b1   :  { %v3789_v56 = vpop.permute.xlu1 %1022  ;;  %v870_v2 = vmul.f32 %v2791_v35, %v284_v59  ;;  %v2793_v52 = vpop.eup %2792  ;;  %v794_v35 = vadd.f32 %v3579_v32, %v734_v50 }
 0x2b2   :  { %2796 = vtanh.f32 %v807_v12  ;;  %v2795_v48 = vpop.eup %2794  ;;  %v864_v0 = vmul.f32 %v2793_v52, %v278_v44  ;;  %v760_v12 = vpop.f32.mrf.mxu2 }
 0x2b3   :  { %1137 = vperm.xlu1 %2749, %v870_v2   ;;  %1117 = vperm.xlu0 %2747, %v866_v9   ;;  %2798 = vtanh.f32 %v797_v62  ;;  %v863_v42 = vmul.f32 %v2795_v48, %v277_v23  ;;  %v737_v9 = vadd.f32 %v3726_v57, %v3690_v36  ;;  %v274_v62 = vld [vmem:[%s4601_s10 + $0xa0] sm:$0xff]  ;;  %v3833_v23 = vpop.f32.mrf.mxu3 }
 0x2b4   :  { %2800 = vtanh.f32 %v801_v43  ;;  %v761_v43 = vadd.f32 %v760_v12, %v3748_v22  ;;  %v272_v22 = vld [vmem:[%s4601_s10 + $0x90] sm:$0xff] }
 0x2b5   :  { %2802 = vtanh.f32 %v796_v6  ;;  %v795_v48 = vadd.f32 %v3579_v32, %v737_v9 }
 0x2b6   :  { %2804 = vtanh.f32 %v794_v35  ;;  %v1058_v50 = vpop.permute.xlu2 %1057  ;;  %v803_v36 = vadd.f32 %v3579_v32, %v761_v43 }
 0x2b7   :  { %2806 = vtanh.f32 %v798_v31 }
 0x2b8   :  { %v2797_v21 = vpop.eup %2796  ;;  %2808 = vtanh.f32 %v793_v19 }
 0x2b9   :  { %v3811_v59 = vpop.permute.xlu1 %1007  ;;  %v871_v17 = vmul.f32 %v2797_v21, %v285_v47  ;;  %v2799_v39 = vpop.eup %2798  ;;  %2810 = vtanh.f32 %v795_v48  ;;  %v1154_v48 = vmul.f32 %v3771_v27, %v3670_v45 }
 0x2ba   :  { %v2801_v33 = vpop.eup %2800  ;;  %v861_v52 = vmul.f32 %v2799_v39, %v275_v55  ;;  %2812 = vtanh.f32 %v803_v36  ;;  %v1159_v55 = vmul.f32 %v1058_v50, %v3736_v13  ;;  %v1157_v13 = vmul.f32 %v3775_v58, %v3724_v54  ;;  %v270_v54 = vld [vmem:[%s4601_s10 + $0x80] sm:$0xff] }
 0x2bb   :  { %1107 = vperm.xlu1 %2749, %v864_v0   ;;  %1142 = vperm.xlu2 %2748, %v871_v17   ;;  %v2803_v2 = vpop.eup %2802  ;;  %v865_v44 = vmul.f32 %v2801_v33, %v279_v51  ;;  %v1053_v0 = vpop.permute.xlu0 %1052  ;;  %v271_v17 = vld [vmem:[%s4601_s10 + $0x88] sm:$0xff]  ;;  %v1149_v36 = vmul.f32 %v3811_v59, %v3569_v49 }
 0x2bc   :  { %1102 = vperm.xlu0 %2747, %v863_v42   ;;  %v860_v47 = vmul.f32 %v2803_v2, %v274_v62  ;;  %v2805_v57 = vpop.eup %2804  ;;  %v728_v42 = vadd.f32 %v3675_v53, %v3623_v18  ;;  %v3850_v9 = vpop.f32.mrf.mxu3  ;;  %v1158_v53 = vmul.f32 %v1053_v0, %v3732_v4  ;;  %v1156_v4 = vmul.f32 %v3761_v28, %v3713_v16 }
 0x2bd   :  { %v2807_v21 = vpop.eup %2806  ;;  %v858_v31 = vmul.f32 %v2805_v57, %v272_v22 }
 0x2be   :  { %v2809_v20 = vpop.eup %2808  ;;  %v862_v39 = vmul.f32 %v2807_v21, %v276_v5  ;;  %v792_v33 = vadd.f32 %v3579_v32, %v728_v42  ;;  %v1028_v2 = vpop.permute.xlu2 %1027  ;;  %v273_v32 = vld [vmem:[%s4601_s10 + $0x98] sm:$0xff] }
 0x2bf   :  { %v857_v12 = vmul.f32 %v2809_v20, %v271_v17  ;;  %v2811_v51 = vpop.eup %2810  ;;  %v1153_v28 = vmul.f32 %v1028_v2, %v3647_v40 }
 0x2c0   :  { %v2813_v18 = vpop.eup %2812  ;;  %2814 = vtanh.f32 %v792_v33 }
 0x2c1   :  { %v3830_v6 = vpop.permute.xlu1 %992 }
 0x2c3   :  { %1092 = vperm.xlu1 %2749, %v861_v52   ;;  %1112 = vperm.xlu2 %2748, %v865_v44   ;;  %v1018_v62 = vpop.permute.xlu0 %1017  ;;  %v859_v52 = vmul.f32 %v2811_v51, %v273_v32  ;;  %v1155_v44 = vmul.f32 %v3807_v61, %v3692_v63  ;;  %v1152_v63 = vmul.f32 %v3789_v56, %v3625_v14 }
 0x2c4   :  { %1087 = vperm.xlu0 %2747, %v860_v47   ;;  %v3870_v50 = vpop.f32.mrf.mxu3  ;;  %v1151_v45 = vmul.f32 %v1018_v62, %v3602_v34  ;;  %v1146_v34 = vmul.f32 %v3830_v6, %v3523_v11 }
 0x2c6   :  { %v2815_v47 = vpop.eup %2814  ;;  %v1013_v58 = vpop.permute.xlu2 %1012 }
 0x2c7   :  { %v856_v16 = vmul.f32 %v2815_v47, %v270_v54  ;;  %v1150_v27 = vmul.f32 %v1013_v58, %v3586_v10  ;;  %v4780_v58 = vld [vmem:[#allocation68_spill] sm:$0xff] }
 0x2c9   :  { %v1063_v35 = vpop.permute.xlu1 %1062 }
 0x2ca   :  { %v1160_v19 = vmul.f32 %v1063_v35, %v3740_v8  ;;  %v281_v8 = vld [vmem:[%s4601_s10 + $0xd8] sm:$0xff] }
 0x2cb   :  { %1077 = vperm.xlu1 %2749, %v858_v31   ;;  %1097 = vperm.xlu2 %2748, %v862_v39   ;;  %v867_v43 = vmul.f32 %v2813_v18, %v281_v8  ;;  %v1003_v61 = vpop.permute.xlu0 %1002 }
 0x2cc   :  { %1072 = vperm.xlu0 %2747, %v857_v12   ;;  %1241 = vmatpush.msra.mxu0 %v1160_v19  ;;  %v967_v40 = vpop.f32.mrf.mxu3  ;;  %v1148_v21 = vmul.f32 %v1003_v61, %v3555_v25 }
 0x2ce   :  { %1242 = vmatpush.msra.mxu0 %v1159_v55  ;;  %v998_v57 = vpop.permute.xlu2 %997 }
 0x2cf   :  { %v1147_v14 = vmul.f32 %v998_v57, %v3537_v60  ;;  %v4788_v57 = vld [vmem:[#allocation64_spill] sm:$0xff] }
 0x2d0   :  { %1243 = vmatpush.msra.mxu0 %v1158_v53 }
 0x2d2   :  { %1244 = vmatpush.msra.mxu0 %v1157_v13 }
 0x2d3   :  { %1122 = vperm.xlu1 %2749, %v867_v43   ;;  %1082 = vperm.xlu2 %2748, %v859_v52   ;;  %v988_v56 = vpop.permute.xlu0 %987  ;;  %v4777_v52 = vld [vmem:[#allocation54_spill] sm:$0xff] }
 0x2d4   :  { %1245 = vmatpush.msra.mxu0 %v1156_v4  ;;  %v1145_v10 = vmul.f32 %v988_v56, %v3505_v24  ;;  %v970_v22 = vpop.f32.mrf.mxu3 }
 0x2d6   :  { %1246 = vmatpush.msra.mxu0 %v1155_v44  ;;  %v4778_v44 = vld [vmem:[#allocation70_spill] sm:$0xff] }
 0x2d8   :  { %1247 = vmatpush.msra.mxu0 %v1154_v48  ;;  %v4779_v48 = vld [vmem:[#allocation69_spill] sm:$0xff] }
 0x2da   :  { %1248 = vmatpush.msra.mxu0 %v1153_v28 }
 0x2db   :  { %1067 = vperm.xlu2 %2748, %v856_v16  }
 0x2dc   :  { %1249 = vmatpush.msra.mxu0 %v1152_v63  ;;  %v973_v49 = vpop.f32.mrf.mxu3  ;;  %v4783_v63 = vld [vmem:[#allocation66_spill] sm:$0xff] }
 0x2de   :  { %1250 = vmatpush.msra.mxu0 %v1151_v45  ;;  %v4785_v45 = vld [vmem:[#allocation60_spill] sm:$0xff] }
 0x2e0   :  { %1251 = vmatpush.msra.mxu0 %v1150_v27  ;;  %v4786_v27 = vld [vmem:[#allocation62_spill] sm:$0xff] }
 0x2e2   :  { %1252 = vmatpush.msra.mxu0 %v1149_v36  ;;  %v4787_v36 = vld [vmem:[#allocation63_spill] sm:$0xff] }
 0x2e4   :  { %1253 = vmatpush.msra.mxu0 %v1148_v21  ;;  %v976_v59 = vpop.f32.mrf.mxu3 }
 0x2e6   :  { %1254 = vmatpush.msra.mxu0 %v1147_v14 }
 0x2e8   :  { %1255 = vmatpush.msra.mxu0 %v1146_v34 }
 0x2ea   :  { %1256 = vmatpush.msra.mxu0 %v1145_v10 }
 0x2eb   :  { %2710 = vmatmul.lmr.bf16.vlgmr.msra.gmra.8.mxu0 }
 0x2ec   :  { %v979_v25 = vpop.f32.mrf.mxu3 }
 0x2f3   :  { %2711 = vmatmul.lmr.bf16.gmra.8.mxu0 }
 0x2f4   :  { %v982_v11 = vpop.f32.mrf.mxu3 }
 0x2fb   :  { %2712 = vmatmul.lmr.bf16.gmra.8.mxu0 }
 0x2fd   :  { %v1128_v60 = vpop.permute.xlu2 %1127 }
 0x2fe   :  { %v1173_v42 = vmul.f32 %v1128_v60, %v973_v49 }
 0x303   :  { %2713 = vmatmul.lmr.bf16.gmra.8.mxu0 }
 0x308   :  { %1209 = vxpose.xlu1.b32.start [1/16] (narrow) %v3352_v26, 64 }
 0x30b   :  { %2714 = vmatmul.lmr.bf16.gmra.8.mxu0 }
 0x310   :  { %1210 = vxpose.xlu1.b32.cont [2/16] (narrow) %v3365_v29, 64 }
 0x313   :  { %2715 = vmatmul.lmr.bf16.gmra.8.mxu0 }
 0x315   :  { %v1143_v6 = vpop.permute.xlu2 %1142 }
 0x316   :  { %v1176_v24 = vmul.f32 %v1143_v6, %v982_v11 }
 0x318   :  { %1211 = vxpose.xlu1.b32.cont [3/16] (narrow) %v3381_v38, 64  ;;  %1282 = vmatpush.msra.mxu0 %v1176_v24 }
 0x31b   :  { %2716 = vmatmul.lmr.bf16.gmra.8.mxu0 }
 0x31d   :  { %v1133_v5 = vpop.permute.xlu0 %1132  ;;  %v1113_v19 = vpop.permute.xlu2 %1112 }
 0x31e   :  { %v1174_v17 = vmul.f32 %v1133_v5, %v976_v59  ;;  %v1170_v53 = vmul.f32 %v1113_v19, %v3870_v50 }
 0x320   :  { %1212 = vxpose.xlu1.b32.cont [4/16] (narrow) %v3393_v46, 64 }
 0x323   :  { %2717 = vmatmul.lmr.bf16.gmra.8.mxu0 }
 0x325   :  { %v1138_v20 = vpop.permute.xlu1 %1137  ;;  %v1118_v39 = vpop.permute.xlu0 %1117 }
 0x326   :  { %v1175_v0 = vmul.f32 %v1138_v20, %v979_v25  ;;  %v1098_v55 = vpop.permute.xlu2 %1097  ;;  %v1171_v18 = vmul.f32 %v1118_v39, %v967_v40 }
 0x327   :  { %v1167_v43 = vmul.f32 %v1098_v55, %v3813_v37  ;;  %v4782_v37 = vld [vmem:[#allocation67_spill] sm:$0xff]  ;;  %v2913_v55 = vld [vmem:[%s4596_s5] sm:$0x3] }
 0x328   :  { %1213 = vxpose.xlu1.b32.cont [5/16] (narrow) %v3411_v1, 64  ;;  %1283 = vmatpush.msra.mxu0 %v1175_v0 }
 0x32a   :  { %1284 = vmatpush.msra.mxu0 %v1174_v17 }
 0x32c   :  { %1285 = vmatpush.msra.mxu0 %v1173_v42 }
 0x32d   :  { %v1108_v35 = vpop.permute.xlu1 %1107 }
 0x32e   :  { %v1103_v33 = vpop.permute.xlu0 %1102  ;;  %v1169_v8 = vmul.f32 %v1108_v35, %v3850_v9  ;;  %v1083_v62 = vpop.permute.xlu2 %1082 }
 0x32f   :  { %v1168_v13 = vmul.f32 %v1103_v33, %v3833_v23  ;;  %v1164_v54 = vmul.f32 %v1083_v62, %v4779_v48  ;;  %v4781_v23 = vld [vmem:[#allocation56_spill] sm:$0xff]  ;;  %v4790_v62 = vld [vmem:[#allocation3_spill] sm:$0xff] }
 0x330   :  { %1214 = vxpose.xlu1.b32.cont [6/16] (narrow) %v3425_v15, 64 }
 0x335   :  { %v1093_v31 = vpop.permute.xlu1 %1092 }
 0x336   :  { %v1088_v32 = vpop.permute.xlu0 %1087  ;;  %v1166_v4 = vmul.f32 %v1093_v31, %v3785_v30  ;;  %v1068_v28 = vpop.permute.xlu2 %1067  ;;  %v4784_v30 = vld [vmem:[#allocation58_spill] sm:$0xff] }
 0x337   :  { %v1165_v47 = vmul.f32 %v1088_v32, %v4778_v44  ;;  %v1161_v61 = vmul.f32 %v1068_v28, %v4783_v63  ;;  %v4789_v31 = vld [vmem:[#allocation2_spill] sm:$0xff] }
 0x338   :  { %1215 = vxpose.xlu1.b32.cont [7/16] (narrow) %v3447_v7, 64  ;;  %v3941_v39 = vmul.f32 0.3, %v4789_v31 }
 0x33d   :  { %v1078_v12 = vpop.permute.xlu1 %1077 }
 0x33e   :  { %v1073_v9 = vpop.permute.xlu0 %1072  ;;  %v1163_v50 = vmul.f32 %v1078_v12, %v4780_v58  ;;  %v2912_v12 = vld [vmem:[%s4597_s6] sm:$0x3] }
 0x33f   :  { %v1162_v16 = vmul.f32 %v1073_v9, %v4782_v37  ;;  %v3949_v33 = vperm.slane %v2912_v12, 1 }
 0x340   :  { %1216 = vxpose.xlu1.b32.cont [8/16] (narrow) %v3463_v3, 64 }
 0x345   :  { %v1123_v51 = vpop.permute.xlu1 %1122 }
 0x346   :  { %v1172_v2 = vmul.f32 %v1123_v51, %v970_v22  ;;  %v3954_v51 = vperm.slane %v2913_v55, 1 }
 0x348   :  { %1217 = vxpose.xlu1.b32.cont [9/16] (narrow) %v3485_v41, 64  ;;  %1286 = vmatpush.msra.mxu0 %v1172_v2 }
 0x34a   :  { %1287 = vmatpush.msra.mxu0 %v1171_v18 }
 0x34c   :  { %1288 = vmatpush.msra.mxu0 %v1170_v53 }
 0x34e   :  { %1289 = vmatpush.msra.mxu0 %v1169_v8 }
 0x350   :  { %1218 = vxpose.xlu1.b32.cont [10/16] (narrow) %v4777_v52, 64  ;;  %1290 = vmatpush.msra.mxu0 %v1168_v13 }
 0x352   :  { %1291 = vmatpush.msra.mxu0 %v1167_v43  ;;  %v3963_v43 = vmul.f32 0.3, %v4790_v62 }
 0x354   :  { %1292 = vmatpush.msra.mxu0 %v1166_v4 }
 0x356   :  { %1293 = vmatpush.msra.mxu0 %v1165_v47 }
 0x358   :  { %1219 = vxpose.xlu1.b32.cont [11/16] (narrow) %v4781_v23, 64  ;;  %1294 = vmatpush.msra.mxu0 %v1164_v54 }
 0x35a   :  { %1295 = vmatpush.msra.mxu0 %v1163_v50  ;;  %v4791_v50 = vld [vmem:[#allocation4_spill] sm:$0xff] }
 0x35b   :  { %v3971_v28 = vmul.f32 0.3, %v4791_v50 }
 0x35c   :  { %1296 = vmatpush.msra.mxu0 %v1162_v16 }
 0x35e   :  { %1297 = vmatpush.msra.mxu0 %v1161_v61 }
 0x360   :  { %1220 = vxpose.xlu1.b32.cont [12/16] (narrow) %v4784_v30, 64 }
 0x368   :  { %1221 = vxpose.xlu1.b32.cont [13/16] (narrow) %v4785_v45, 64  ;;  %v3928_v22 = vpop.f32.mrf.mxu0 }
 0x370   :  { %1222 = vxpose.xlu1.b32.cont [14/16] (narrow) %v4786_v27, 64  ;;  %v3935_v25 = vpop.f32.mrf.mxu0 }
 0x378   :  { %1223 = vxpose.xlu1.b32.cont [15/16] (narrow) %v4787_v36, 64  ;;  %v1264_v60 = vpop.f32.mrf.mxu0 }
 0x380   :  { %1224 = vxpose.xlu1.b32.end [16/16] (narrow) %v4788_v57, 64  ;;  %v1267_v11 = vpop.f32.mrf.mxu0 }
 0x388   :  { %v1270_v6 = vpop.f32.mrf.mxu0 }
 0x390   :  { %v1273_v24 = vpop.f32.mrf.mxu0 }
 0x398   :  { %v1276_v5 = vpop.f32.mrf.mxu0 }
 0x3a0   :  { %v1279_v20 = vpop.f32.mrf.mxu0 }
 0x3ac   :  { %v3910_v40 = vpop.trf.xlu1 }
 0x3ad   :  { %1298 = vmatmul.f32.vlgmr.msra.gmra.mxu0 %v3910_v40 }
 0x3b4   :  { %v3913_v21 = vpop.trf.xlu1 }
 0x3b5   :  { %1301 = vmatmul.f32.gmra.mxu0 %v3913_v21 }
 0x3bc   :  { %v3916_v14 = vpop.trf.xlu1 }
 0x3bd   :  { %1304 = vmatmul.f32.gmra.mxu0 %v3916_v14 }
 0x3c4   :  { %v3919_v56 = vpop.trf.xlu1 }
 0x3c5   :  { %1307 = vmatmul.f32.gmra.mxu0 %v3919_v56 }
 0x3cc   :  { %v3922_v34 = vpop.trf.xlu1 }
 0x3cd   :  { %1310 = vmatmul.f32.gmra.mxu0 %v3922_v34 }
 0x3d4   :  { %v3925_v10 = vpop.trf.xlu1 }
 0x3d5   :  { %1313 = vmatmul.f32.gmra.mxu0 %v3925_v10 }
 0x3dc   :  { %v3930_v49 = vpop.trf.xlu1 }
 0x3dd   :  { %1316 = vmatmul.f32.gmra.mxu0 %v3930_v49 }
 0x3e4   :  { %v3933_v59 = vpop.trf.xlu1 }
 0x3e5   :  { %1319 = vmatmul.f32.gmra.mxu0 %v3933_v59 }
 0x42a   :  { %v3938_v0 = vpop.f32.mrf.mxu0 }
 0x432   :  { %v1302_v17 = vpop.f32.mrf.mxu0 }
 0x43a   :  { %v1305_v42 = vpop.f32.mrf.mxu0 }
 0x43b   :  { %v1306_v35 = vadd.f32 %v1305_v42, %v1264_v60 }
 0x43d   :  { %v3944_v19 = vadd.f32 %v3941_v39, %v1306_v35  ;;  %v4792_v35 = vld [vmem:[#allocation5_spill] sm:$0xff] }
 0x43e   :  { %v3979_v31 = vmul.f32 0.3, %v4792_v35 }
 0x43f   :  { %v1375_v2 = vmul.f32 %v3949_v33, %v3944_v19  ;;  %v1342_v18 = vmul.f32 %v3954_v51, %v3944_v19 }
 0x441   :  { %v1387_v53 = vsel %vm298_vm1, %v1375_v2, 0.0  ;;  %v1354_v8 = vsel %vm298_vm1, %v1342_v18, 0.0 }
 0x442   :  { %v1308_v32 = vpop.f32.mrf.mxu0  ;;  %1388 = vadd.xlane.f32.xlu0 %v1387_v53  ;;  %1355 = vadd.xlane.f32.xlu2 %v1354_v8 }
 0x443   :  { %v1309_v13 = vadd.f32 %v1308_v32, %v1267_v11  ;;  %v4793_v32 = vld [vmem:[#allocation7_spill] sm:$0xff] }
 0x445   :  { %v1334_v4 = vadd.f32 %v3963_v43, %v1309_v13  ;;  %v3987_v13 = vmul.f32 0.3, %v4793_v32  ;;  %v4799_v32 = vld [vmem:[#allocation13_spill] sm:$0xff] }
 0x447   :  { %v1376_v44 = vmul.f32 %v3949_v33, %v1334_v4  ;;  %v1343_v47 = vmul.f32 %v3954_v51, %v1334_v4 }
 0x449   :  { %v1390_v48 = vsel %vm298_vm1, %v1376_v44, 0.0  ;;  %v1357_v54 = vsel %vm298_vm1, %v1343_v47, 0.0 }
 0x44a   :  { %v1311_v9 = vpop.f32.mrf.mxu0  ;;  %1391 = vadd.xlane.f32.xlu0 %v1390_v48  ;;  %1358 = vadd.xlane.f32.xlu2 %v1357_v54 }
 0x44b   :  { %v1312_v58 = vadd.f32 %v1311_v9, %v1270_v6 }
 0x44d   :  { %v1335_v37 = vadd.f32 %v3971_v28, %v1312_v58  ;;  %v4794_v58 = vld [vmem:[#allocation8_spill] sm:$0xff] }
 0x44e   :  { %v3995_v50 = vmul.f32 0.3, %v4794_v58 }
 0x44f   :  { %v1377_v16 = vmul.f32 %v3949_v33, %v1335_v37  ;;  %v1344_v63 = vmul.f32 %v3954_v51, %v1335_v37 }
 0x451   :  { %v1393_v61 = vsel %vm298_vm1, %v1377_v16, 0.0  ;;  %v1360_v60 = vsel %vm298_vm1, %v1344_v63, 0.0  ;;  %v4795_v63 = vld [vmem:[#allocation9_spill] sm:$0xff] }
 0x452   :  { %v1314_v11 = vpop.f32.mrf.mxu0  ;;  %1394 = vadd.xlane.f32.xlu0 %v1393_v61  ;;  %1361 = vadd.xlane.f32.xlu2 %v1360_v60  ;;  %v4000_v61 = vmul.f32 0.3, %v4795_v63 }
 0x453   :  { %v1315_v42 = vadd.f32 %v1314_v11, %v1273_v24 }
 0x455   :  { %v1336_v6 = vadd.f32 %v3979_v31, %v1315_v42 }
 0x457   :  { %v1378_v12 = vmul.f32 %v3949_v33, %v1336_v6  ;;  %v1345_v55 = vmul.f32 %v3954_v51, %v1336_v6 }
 0x459   :  { %v1396_v2 = vsel %vm298_vm1, %v1378_v12, 0.0  ;;  %v1363_v18 = vsel %vm298_vm1, %v1345_v55, 0.0  ;;  %v4796_v55 = vld [vmem:[#allocation6_spill] sm:$0xff] }
 0x45a   :  { %v1317_v53 = vpop.f32.mrf.mxu0  ;;  %1397 = vadd.xlane.f32.xlu0 %v1396_v2  ;;  %1364 = vadd.xlane.f32.xlu2 %v1363_v18  ;;  %v4012_v2 = vmul.f32 0.3, %v4796_v55 }
 0x45b   :  { %v1318_v8 = vadd.f32 %v1317_v53, %v1276_v5  ;;  %v1303_v5 = vadd.f32 %v1302_v17, %v3935_v25  ;;  %v1300_v25 = vadd.f32 %v3938_v0, %v3928_v22 }
 0x45d   :  { %v1337_v24 = vadd.f32 %v3987_v13, %v1318_v8  ;;  %v1332_v42 = vadd.f32 %v4000_v61, %v1303_v5  ;;  %v1331_v18 = vadd.f32 %v4012_v2, %v1300_v25  ;;  %v4806_v5 = vld [vmem:[#allocation34_spill] sm:$0xff] }
 0x45f   :  { %v1379_v62 = vmul.f32 %v3949_v33, %v1337_v24  ;;  %v1346_v44 = vmul.f32 %v3954_v51, %v1337_v24  ;;  %v1374_v17 = vmul.f32 %v3949_v33, %v1332_v42  ;;  %v1341_v12 = vmul.f32 %v3954_v51, %v1332_v42 }
 0x460   :  { %v1373_v22 = vmul.f32 %v3949_v33, %v1331_v18  ;;  %v1340_v0 = vmul.f32 %v3954_v51, %v1331_v18 }
 0x461   :  { %v1399_v47 = vsel %vm298_vm1, %v1379_v62, 0.0  ;;  %v1366_v48 = vsel %vm298_vm1, %v1346_v44, 0.0  ;;  %v1384_v53 = vsel %vm298_vm1, %v1374_v17, 0.0  ;;  %v4803_v62 = vld [vmem:[#allocation28_spill] sm:$0xff]  ;;  %v4804_v44 = vld [vmem:[#allocation30_spill] sm:$0xff] }
 0x462   :  { %v1320_v54 = vpop.f32.mrf.mxu0  ;;  %1400 = vadd.xlane.f32.xlu0 %v1399_v47  ;;  %1367 = vadd.xlane.f32.xlu2 %v1366_v48  ;;  %v1348_v8 = vsel %vm298_vm1, %v1340_v0, 0.0  ;;  %v4809_v17 = vld [vmem:[#allocation42_spill] sm:$0xff] }
 0x463   :  { %v1321_v9 = vadd.f32 %v1320_v54, %v1279_v20  ;;  %v4805_v54 = vld [vmem:[#allocation32_spill] sm:$0xff] }
 0x465   :  { %v1338_v16 = vadd.f32 %v3995_v50, %v1321_v9 }
 0x467   :  { %1736 = vmatpush.msrb.mxu2 %v1338_v16  ;;  %v1347_v60 = vmul.f32 %v3954_v51, %v1338_v16  ;;  %v1380_v11 = vmul.f32 %v3949_v33, %v1338_v16  ;;  %v4801_v33 = vld [vmem:[#allocation20_spill] sm:$0xff] }
 0x468   :  { %v4802_v51 = vld [vmem:[#allocation24_spill] sm:$0xff] }
 0x469   :  { %1737 = vmatpush.msrb.mxu2 %v1337_v24  ;;  %v1369_v20 = vsel %vm298_vm1, %v1347_v60, 0.0  ;;  %v1402_v35 = vsel %vm298_vm1, %v1380_v11, 0.0  ;;  %v4800_v24 = vld [vmem:[#allocation16_spill] sm:$0xff]  ;;  %v4807_v60 = vld [vmem:[#allocation38_spill] sm:$0xff] }
 0x46a   :  { %1370 = vadd.xlane.f32.xlu0 %v1369_v20  ;;  %1403 = vadd.xlane.f32.xlu2 %v1402_v35  ;;  %v4808_v20 = vld [vmem:[#allocation41_spill] sm:$0xff] }
 0x46b   :  { %1738 = vmatpush.msrb.mxu2 %v1336_v6  ;;  %v1351_v6 = vsel %vm298_vm1, %v1341_v12, 0.0 }
 0x46d   :  { %1739 = vmatpush.msrb.mxu2 %v1335_v37  ;;  %v4797_v37 = vld [vmem:[#allocation10_spill] sm:$0xff] }
 0x46f   :  { %1740 = vmatpush.msrb.mxu2 %v1334_v4  ;;  %v1381_v4 = vsel %vm298_vm1, %v1373_v22, 0.0  ;;  %v4811_v22 = vld [vmem:[#allocation44_spill] sm:$0xff] }
 0x471   :  { %1741 = vmatpush.msrb.mxu2 %v3944_v19  ;;  %v4798_v19 = vld [vmem:[#allocation12_spill] sm:$0xff] }
 0x472   :  { %1385 = vadd.xlane.f32.xlu0 %v1384_v53  ;;  %1352 = vadd.xlane.f32.xlu2 %v1351_v6 }
 0x473   :  { %1742 = vmatpush.msrb.mxu2 %v1332_v42 }
 0x475   :  { %1743 = vmatpush.msrb.mxu2 %v1331_v18  ;;  %v4810_v18 = vld [vmem:[#allocation43_spill] sm:$0xff] }
 0x476   :  { %2473 = vmatmul.msk.f32.vlgmr.msrb.gmra.mxu2 %vm356_vm2, %v4797_v37 }
 0x47a   :  { %1382 = vadd.xlane.f32.xlu0 %v1381_v4  ;;  %1349 = vadd.xlane.f32.xlu2 %v1348_v8  ;;  %v4812_v8 = vld [vmem:[#allocation15_spill] sm:$0xff] }
 0x47e   :  { %2474 = vmatmul.msk.f32.gmra.mxu2 %vm356_vm2, %v4798_v19 }
 0x486   :  { %2475 = vmatmul.msk.f32.gmra.mxu2 %vm356_vm2, %v4799_v32 }
 0x48e   :  { %2476 = vmatmul.msk.f32.gmra.mxu2 %vm356_vm2, %v4800_v24 }
 0x496   :  { %2477 = vmatmul.msk.f32.gmra.mxu2 %vm356_vm2, %v4801_v33 }
 0x49e   :  { %2478 = vmatmul.msk.f32.gmra.mxu2 %vm356_vm2, %v4802_v51 }
 0x4a6   :  { %2479 = vmatmul.msk.f32.gmra.mxu2 %vm356_vm2, %v4803_v62 }
 0x4ae   :  { %2480 = vmatmul.msk.f32.gmra.mxu2 %vm356_vm2, %v4804_v44 }
 0x4b5   :  { %v1389_v47 = vpop.xlane.xlu0 %1388  ;;  %v1356_v48 = vpop.xlane.xlu2 %1355 }
 0x4b6   :  { %2481 = vmatmul.msk.f32.gmra.mxu2 %vm356_vm2, %v4805_v54 }
 0x4bd   :  { %v1392_v9 = vpop.xlane.xlu0 %1391  ;;  %v1359_v58 = vpop.xlane.xlu2 %1358 }
 0x4be   :  { %2482 = vmatmul.msk.f32.gmra.mxu2 %vm356_vm2, %v4806_v5 }
 0x4c5   :  { %v1395_v16 = vpop.xlane.xlu0 %1394  ;;  %v1362_v63 = vpop.xlane.xlu2 %1361 }
 0x4c6   :  { %2483 = vmatmul.msk.f32.gmra.mxu2 %vm356_vm2, %v4807_v60 }
 0x4cd   :  { %v1398_v11 = vpop.xlane.xlu0 %1397  ;;  %v1365_v42 = vpop.xlane.xlu2 %1364 }
 0x4ce   :  { %2484 = vmatmul.msk.f32.gmra.mxu2 %vm356_vm2, %v4808_v20 }
 0x4d5   :  { %v1401_v35 = vpop.xlane.xlu0 %1400  ;;  %v1368_v25 = vpop.xlane.xlu2 %1367 }
 0x4d6   :  { %2485 = vmatmul.msk.f32.gmra.mxu2 %vm356_vm2, %v4809_v17 }
 0x4dd   :  { %v1371_v12 = vpop.xlane.xlu0 %1370  ;;  %v1404_v55 = vpop.xlane.xlu2 %1403 }
 0x4de   :  { %1413 = vmatpush.msra.mxu0 %v1404_v55  ;;  %1526 = vmatpush.msrb.mxu1 %v1371_v12  ;;  %v4829_v12 = vld [vmem:[#allocation53_spill] sm:$0xff] }
 0x4df   :  { %2486 = vmatmul.msk.f32.gmra.mxu2 %vm356_vm2, %v4810_v18  ;;  %v4831_v55 = vld [vmem:[#allocation33_spill] sm:$0xff] }
 0x4e0   :  { %1414 = vmatpush.msra.mxu0 %v1401_v35  ;;  %1527 = vmatpush.msrb.mxu1 %v1368_v25  ;;  %v4825_v35 = vld [vmem:[#allocation51_spill] sm:$0xff]  ;;  %v4827_v25 = vld [vmem:[#allocation52_spill] sm:$0xff] }
 0x4e2   :  { %1415 = vmatpush.msra.mxu0 %v1398_v11  ;;  %1528 = vmatpush.msrb.mxu1 %v1365_v42  ;;  %v4821_v11 = vld [vmem:[#allocation49_spill] sm:$0xff]  ;;  %v4823_v42 = vld [vmem:[#allocation50_spill] sm:$0xff] }
 0x4e4   :  { %1416 = vmatpush.msra.mxu0 %v1395_v16  ;;  %1529 = vmatpush.msrb.mxu1 %v1362_v63  ;;  %v4813_v16 = vld [vmem:[#allocation45_spill] sm:$0xff]  ;;  %v4819_v63 = vld [vmem:[#allocation48_spill] sm:$0xff] }
 0x4e5   :  { %v1386_v53 = vpop.xlane.xlu0 %1385  ;;  %v1353_v6 = vpop.xlane.xlu2 %1352 }
 0x4e6   :  { %1417 = vmatpush.msra.mxu0 %v1392_v9  ;;  %1530 = vmatpush.msrb.mxu1 %v1359_v58  ;;  %v4814_v9 = vld [vmem:[#allocation18_spill] sm:$0xff]  ;;  %v4817_v58 = vld [vmem:[#allocation47_spill] sm:$0xff] }
 0x4e7   :  { %2487 = vmatmul.msk.f32.gmra.mxu2 %vm356_vm2, %v4811_v22 }
 0x4e8   :  { %1418 = vmatpush.msra.mxu0 %v1389_v47  ;;  %1531 = vmatpush.msrb.mxu1 %v1356_v48  ;;  %v4815_v47 = vld [vmem:[#allocation46_spill] sm:$0xff] }
 0x4e9   :  { %v4816_v48 = vld [vmem:[#allocation22_spill] sm:$0xff] }
 0x4ea   :  { %1419 = vmatpush.msra.mxu0 %v1386_v53  ;;  %1532 = vmatpush.msrb.mxu1 %v1353_v6  ;;  %v4834_v53 = vld [vmem:[#allocation39_spill] sm:$0xff] }
 0x4ed   :  { %v1383_v0 = vpop.xlane.xlu0 %1382  ;;  %v1350_v4 = vpop.xlane.xlu2 %1349 }
 0x4ee   :  { %1420 = vmatpush.msra.mxu0 %v1383_v0  ;;  %1533 = vmatpush.msrb.mxu1 %v1350_v4 }
 0x4ef   :  { %2409 = vmatmul.msk.f32.vlgmr.msra.gmra.mxu0 %vm356_vm2, %v4812_v8  ;;  %2441 = vmatmul.msk.f32.vlgmr.msrb.gmra.mxu1 %vm356_vm2, %v4797_v37  ;;  %v4818_v37 = vld [vmem:[#allocation26_spill] sm:$0xff] }
 0x4f0   :  { %2488 = vmatmul.msk.f32.gmra.mxu2 %vm356_vm2, %v4813_v16 }
 0x4f7   :  { %2410 = vmatmul.msk.f32.gmra.mxu0 %vm356_vm2, %v4814_v9  ;;  %2442 = vmatmul.msk.f32.gmra.mxu1 %vm356_vm2, %v4798_v19  ;;  %v4820_v19 = vld [vmem:[#allocation14_spill] sm:$0xff]  ;;  %v4837_v9 = vld [vmem:[#allocation65_spill] sm:$0xff] }
 0x4f8   :  { %2489 = vmatmul.msk.f32.gmra.mxu2 %vm356_vm2, %v4815_v47 }
 0x4ff   :  { %2411 = vmatmul.msk.f32.gmra.mxu0 %vm356_vm2, %v4816_v48  ;;  %2443 = vmatmul.msk.f32.gmra.mxu1 %vm356_vm2, %v4799_v32  ;;  %v4822_v32 = vld [vmem:[#allocation17_spill] sm:$0xff] }
 0x500   :  { %2490 = vmatmul.msk.f32.gmra.mxu2 %vm356_vm2, %v4817_v58 }
 0x507   :  { %2412 = vmatmul.msk.f32.gmra.mxu0 %vm356_vm2, %v4818_v37  ;;  %2444 = vmatmul.msk.f32.gmra.mxu1 %vm356_vm2, %v4800_v24  ;;  %v4824_v24 = vld [vmem:[#allocation21_spill] sm:$0xff] }
 0x508   :  { %2491 = vmatmul.msk.f32.gmra.mxu2 %vm356_vm2, %v4819_v63 }
 0x50f   :  { %2413 = vmatmul.msk.f32.gmra.mxu0 %vm356_vm2, %v4820_v19  ;;  %2445 = vmatmul.msk.f32.gmra.mxu1 %vm356_vm2, %v4801_v33  ;;  %v4826_v33 = vld [vmem:[#allocation25_spill] sm:$0xff] }
 0x510   :  { %2492 = vmatmul.msk.f32.gmra.mxu2 %vm356_vm2, %v4821_v11 }
 0x517   :  { %2414 = vmatmul.msk.f32.gmra.mxu0 %vm356_vm2, %v4822_v32  ;;  %2446 = vmatmul.msk.f32.gmra.mxu1 %vm356_vm2, %v4802_v51  ;;  %v4828_v51 = vld [vmem:[#allocation29_spill] sm:$0xff] }
 0x518   :  { %2493 = vmatmul.msk.f32.gmra.mxu2 %vm356_vm2, %v4823_v42 }
 0x51f   :  { %2415 = vmatmul.msk.f32.gmra.mxu0 %vm356_vm2, %v4824_v24  ;;  %2447 = vmatmul.msk.f32.gmra.mxu1 %vm356_vm2, %v4803_v62  ;;  %v4830_v62 = vld [vmem:[#allocation31_spill] sm:$0xff] }
 0x520   :  { %2494 = vmatmul.msk.f32.gmra.mxu2 %vm356_vm2, %v4825_v35 }
 0x527   :  { %2416 = vmatmul.msk.f32.gmra.mxu0 %vm356_vm2, %v4826_v33  ;;  %2448 = vmatmul.msk.f32.gmra.mxu1 %vm356_vm2, %v4804_v44  ;;  %v4832_v44 = vld [vmem:[#allocation35_spill] sm:$0xff] }
 0x528   :  { %2495 = vmatmul.msk.f32.gmra.mxu2 %vm356_vm2, %v4827_v25 }
 0x52f   :  { %2417 = vmatmul.msk.f32.gmra.mxu0 %vm356_vm2, %v4828_v51  ;;  %2449 = vmatmul.msk.f32.gmra.mxu1 %vm356_vm2, %v4805_v54  ;;  %v4833_v54 = vld [vmem:[#allocation40_spill] sm:$0xff] }
 0x530   :  { %2496 = vmatmul.msk.f32.gmra.mxu2 %vm356_vm2, %v4829_v12 }
 0x537   :  { %2418 = vmatmul.msk.f32.gmra.mxu0 %vm356_vm2, %v4830_v62  ;;  %2450 = vmatmul.msk.f32.gmra.mxu1 %vm356_vm2, %v4806_v5  ;;  %v4835_v5 = vld [vmem:[#allocation37_spill] sm:$0xff]  ;;  %v4205_v62 = vpop.f32.mrf.mxu2 }
 0x53f   :  { %2419 = vmatmul.msk.f32.gmra.mxu0 %vm356_vm2, %v4831_v55  ;;  %2451 = vmatmul.msk.f32.gmra.mxu1 %vm356_vm2, %v4807_v60  ;;  %v4836_v60 = vld [vmem:[#allocation36_spill] sm:$0xff] }
 0x547   :  { %2420 = vmatmul.msk.f32.gmra.mxu0 %vm356_vm2, %v4832_v44  ;;  %2452 = vmatmul.msk.f32.gmra.mxu1 %vm356_vm2, %v4808_v20  ;;  %v2914_v20 = vld [vmem:[%s4600_s7] sm:$0x3] }
 0x54f   :  { %2421 = vmatmul.msk.f32.gmra.mxu0 %vm356_vm2, %v4833_v54  ;;  %2453 = vmatmul.msk.f32.gmra.mxu1 %vm356_vm2, %v4809_v17  ;;  %v4137_v17 = vperm.slane %v2914_v20, 1  ;;  %v4214_v54 = vpop.f32.mrf.mxu2 }
 0x557   :  { %2422 = vmatmul.msk.f32.gmra.mxu0 %vm356_vm2, %v4834_v53  ;;  %2454 = vmatmul.msk.f32.gmra.mxu1 %vm356_vm2, %v4810_v18 }
 0x55f   :  { %2423 = vmatmul.msk.f32.gmra.mxu0 %vm356_vm2, %v4835_v5  ;;  %2455 = vmatmul.msk.f32.gmra.mxu1 %vm356_vm2, %v4811_v22 }
 0x567   :  { %2424 = vmatmul.msk.f32.gmra.mxu0 %vm356_vm2, %v4836_v60  ;;  %2456 = vmatmul.msk.f32.gmra.mxu1 %vm356_vm2, %v4813_v16  ;;  %v4840_v60 = vld [vmem:[#allocation59_spill] sm:$0xff] }
 0x56c   :  { %v1422_v6 = vpop.f32.mrf.mxu0  ;;  %v1535_v18 = vpop.f32.mrf.mxu1 }
 0x56d   :  { %v1536_v0 = vadd.f32 %v1535_v18, %v1422_v6 }
 0x56f   :  { %v1632_v4 = vadd.f32 %v4137_v17, %v1536_v0  ;;  %2425 = vmatmul.msk.f32.gmra.mxu0 %vm356_vm2, %v3352_v26  ;;  %2457 = vmatmul.msk.f32.gmra.mxu1 %vm356_vm2, %v4815_v47 }
 0x571   :  { %2816 = vtanh.f32 %v1632_v4  ;;  %v4226_v4 = vpop.f32.mrf.mxu2 }
 0x574   :  { %v4144_v22 = vpop.f32.mrf.mxu0  ;;  %v4146_v8 = vpop.f32.mrf.mxu1 }
 0x577   :  { %v2817_v16 = vpop.eup %2816  ;;  %2426 = vmatmul.msk.f32.gmra.mxu0 %vm356_vm2, %v3365_v29  ;;  %2458 = vmatmul.msk.f32.gmra.mxu1 %vm356_vm2, %v4817_v58 }
 0x578   :  { %v1696_v48 = vmul.f32 %v2817_v16, %v4837_v9  ;;  %v4841_v9 = vld [vmem:[#allocation61_spill] sm:$0xff] }
 0x57a   :  { %1843 = vperm.xlu1 %2749, %v1696_v48   ;;  %v2916_v48 = vld [vmem:[%s4601_s10 + $0x50] sm:$0xff] }
 0x57c   :  { %v4153_v37 = vpop.f32.mrf.mxu0  ;;  %v4155_v26 = vpop.f32.mrf.mxu1 }
 0x57f   :  { %2427 = vmatmul.msk.f32.gmra.mxu0 %vm356_vm2, %v3381_v38  ;;  %2459 = vmatmul.msk.f32.gmra.mxu1 %vm356_vm2, %v4819_v63 }
 0x584   :  { %v4161_v47 = vpop.f32.mrf.mxu0  ;;  %v4163_v19 = vpop.f32.mrf.mxu1 }
 0x587   :  { %2428 = vmatmul.msk.f32.gmra.mxu0 %vm356_vm2, %v3393_v46  ;;  %2460 = vmatmul.msk.f32.gmra.mxu1 %vm356_vm2, %v4821_v11 }
 0x58c   :  { %v4169_v29 = vpop.f32.mrf.mxu0  ;;  %v4171_v58 = vpop.f32.mrf.mxu1 }
 0x58f   :  { %2429 = vmatmul.msk.f32.gmra.mxu0 %vm356_vm2, %v3411_v1  ;;  %2461 = vmatmul.msk.f32.gmra.mxu1 %vm356_vm2, %v4823_v42 }
 0x594   :  { %v4177_v38 = vpop.f32.mrf.mxu0  ;;  %v4179_v63 = vpop.f32.mrf.mxu1 }
 0x597   :  { %2430 = vmatmul.msk.f32.gmra.mxu0 %vm356_vm2, %v3425_v15  ;;  %2462 = vmatmul.msk.f32.gmra.mxu1 %vm356_vm2, %v4825_v35 }
 0x59c   :  { %v4185_v46 = vpop.f32.mrf.mxu0  ;;  %v4187_v11 = vpop.f32.mrf.mxu1 }
 0x59f   :  { %2431 = vmatmul.msk.f32.gmra.mxu0 %vm356_vm2, %v3447_v7  ;;  %2463 = vmatmul.msk.f32.gmra.mxu1 %vm356_vm2, %v4827_v25  ;;  %v4838_v7 = vld [vmem:[#allocation55_spill] sm:$0xff] }
 0x5a0   :  { %2497 = vmatmul.msk.f32.gmra.mxu2 %vm356_vm2, %v4838_v7 }
 0x5a4   :  { %v1443_v1 = vpop.f32.mrf.mxu0  ;;  %v1556_v32 = vpop.f32.mrf.mxu1 }
 0x5a5   :  { %v4193_v42 = vadd.f32 %v1556_v32, %v1443_v1 }
 0x5a7   :  { %2432 = vmatmul.msk.f32.gmra.mxu0 %vm356_vm2, %v3463_v3  ;;  %2464 = vmatmul.msk.f32.gmra.mxu1 %vm356_vm2, %v4829_v12  ;;  %v4839_v12 = vld [vmem:[#allocation57_spill] sm:$0xff] }
 0x5a8   :  { %2498 = vmatmul.msk.f32.gmra.mxu2 %vm356_vm2, %v4839_v12 }
 0x5ac   :  { %v1446_v15 = vpop.f32.mrf.mxu0  ;;  %v1559_v24 = vpop.f32.mrf.mxu1 }
 0x5ad   :  { %v4199_v35 = vadd.f32 %v1559_v24, %v1446_v15 }
 0x5af   :  { %2433 = vmatmul.msk.f32.gmra.mxu0 %vm356_vm2, %v3485_v41  ;;  %2465 = vmatmul.msk.f32.gmra.mxu1 %vm356_vm2, %v4838_v7  ;;  %v4238_v7 = vpop.f32.mrf.mxu2 }
 0x5b0   :  { %2499 = vmatmul.msk.f32.gmra.mxu2 %vm356_vm2, %v4840_v60 }
 0x5b4   :  { %v1449_v33 = vpop.f32.mrf.mxu0  ;;  %v1562_v25 = vpop.f32.mrf.mxu1 }
 0x5b5   :  { %v1563_v51 = vadd.f32 %v1562_v25, %v1449_v33  ;;  %v4842_v25 = vld [vmem:[#allocation11_spill] sm:$0xff] }
 0x5b7   :  { %v1641_v3 = vadd.f32 %v4137_v17, %v1563_v51  ;;  %2434 = vmatmul.msk.f32.gmra.mxu0 %vm356_vm2, %v4777_v52  ;;  %2466 = vmatmul.msk.f32.gmra.mxu1 %vm356_vm2, %v4839_v12  ;;  %v2915_v52 = vld [vmem:[%s4601_s10 + $0x48] sm:$0xff]  ;;  %v2917_v51 = vld [vmem:[%s4601_s10 + $0x58] sm:$0xff] }
 0x5b8   :  { %2500 = vmatmul.msk.f32.gmra.mxu2 %vm356_vm2, %v4841_v9 }
 0x5b9   :  { %2818 = vtanh.f32 %v1641_v3 }
 0x5bc   :  { %v1452_v41 = vpop.f32.mrf.mxu0  ;;  %v1565_v55 = vpop.f32.mrf.mxu1 }
 0x5bd   :  { %v1566_v44 = vadd.f32 %v1565_v55, %v1452_v41 }
 0x5bf   :  { %v2819_v53 = vpop.eup %2818  ;;  %v1642_v5 = vadd.f32 %v4137_v17, %v1566_v44  ;;  %2435 = vmatmul.msk.f32.gmra.mxu0 %vm356_vm2, %v4781_v23  ;;  %2467 = vmatmul.msk.f32.gmra.mxu1 %vm356_vm2, %v4840_v60  ;;  %v4250_v44 = vpop.f32.mrf.mxu2  ;;  %v2918_v60 = vld [vmem:[%s4601_s10 + $0x60] sm:$0xff] }
 0x5c0   :  { %v1705_v20 = vmul.f32 %v2915_v52, %v2819_v53  ;;  %2501 = vmatmul.msk.f32.gmra.mxu2 %vm356_vm2, %v4842_v25 }
 0x5c1   :  { %2820 = vtanh.f32 %v1642_v5  ;;  %v4843_v5 = vld [vmem:[#allocation19_spill] sm:$0xff] }
 0x5c2   :  { %1888 = vperm.xlu0 %2747, %v1705_v20  }
 0x5c4   :  { %v1455_v6 = vpop.f32.mrf.mxu0  ;;  %v1568_v18 = vpop.f32.mrf.mxu1 }
 0x5c5   :  { %v1569_v0 = vadd.f32 %v1568_v18, %v1455_v6 }
 0x5c7   :  { %v2821_v16 = vpop.eup %2820  ;;  %v1643_v23 = vadd.f32 %v4137_v17, %v1569_v0  ;;  %2436 = vmatmul.msk.f32.gmra.mxu0 %vm356_vm2, %v4784_v30  ;;  %2468 = vmatmul.msk.f32.gmra.mxu1 %vm356_vm2, %v4841_v9  ;;  %v4262_v0 = vpop.f32.mrf.mxu2  ;;  %v2919_v9 = vld [vmem:[%s4601_s10 + $0x68] sm:$0xff] }
 0x5c8   :  { %v1706_v1 = vmul.f32 %v2916_v48, %v2821_v16  ;;  %2502 = vmatmul.msk.f32.gmra.mxu2 %vm356_vm2, %v4843_v5 }
 0x5c9   :  { %2822 = vtanh.f32 %v1643_v23  ;;  %v4844_v23 = vld [vmem:[#allocation23_spill] sm:$0xff] }
 0x5ca   :  { %1893 = vperm.xlu2 %2748, %v1706_v1   ;;  %v1639_v1 = vadd.f32 %v4137_v17, %v4193_v42  ;;  %v2920_v42 = vld [vmem:[%s4601_s10 + $0x70] sm:$0xff] }
 0x5cc   :  { %v1458_v32 = vpop.f32.mrf.mxu0  ;;  %v1571_v15 = vpop.f32.mrf.mxu1 }
 0x5cd   :  { %v1572_v24 = vadd.f32 %v1571_v15, %v1458_v32 }
 0x5cf   :  { %v2823_v33 = vpop.eup %2822  ;;  %v1644_v30 = vadd.f32 %v4137_v17, %v1572_v24  ;;  %2437 = vmatmul.msk.f32.gmra.mxu0 %vm356_vm2, %v4785_v45  ;;  %2469 = vmatmul.msk.f32.gmra.mxu1 %vm356_vm2, %v4842_v25 }
 0x5d0   :  { %v1707_v3 = vmul.f32 %v2917_v51, %v2823_v33  ;;  %v4276_v33 = vpop.f32.mrf.mxu2  ;;  %2503 = vmatmul.msk.f32.gmra.mxu2 %vm356_vm2, %v4844_v23  ;;  %v4845_v51 = vld [vmem:[#allocation27_spill] sm:$0xff] }
 0x5d1   :  { %2824 = vtanh.f32 %v1644_v30 }
 0x5d2   :  { %1898 = vperm.xlu0 %2747, %v1707_v3  }
 0x5d4   :  { %v1461_v12 = vpop.f32.mrf.mxu0  ;;  %v1574_v41 = vpop.f32.mrf.mxu1 }
 0x5d5   :  { %v1575_v55 = vadd.f32 %v1574_v41, %v1461_v12 }
 0x5d7   :  { %v2825_v53 = vpop.eup %2824  ;;  %v1645_v45 = vadd.f32 %v4137_v17, %v1575_v55  ;;  %2438 = vmatmul.msk.f32.gmra.mxu0 %vm356_vm2, %v4786_v27  ;;  %2470 = vmatmul.msk.f32.gmra.mxu1 %vm356_vm2, %v4843_v5 }
 0x5d8   :  { %v1708_v52 = vmul.f32 %v2918_v60, %v2825_v53  ;;  %v1554_v60 = vadd.f32 %v4187_v11, %v4185_v46 }
 0x5d9   :  { %2826 = vtanh.f32 %v1645_v45  ;;  %v1545_v45 = vadd.f32 %v4163_v19, %v4161_v47 }
 0x5da   :  { %1903 = vperm.xlu2 %2748, %v1708_v52   ;;  %v1638_v47 = vadd.f32 %v4137_v17, %v1554_v60 }
 0x5dc   :  { %v1464_v20 = vpop.f32.mrf.mxu0  ;;  %v1577_v6 = vpop.f32.mrf.mxu1 }
 0x5dd   :  { %v1578_v18 = vadd.f32 %v1577_v6, %v1464_v20  ;;  %v2922_v20 = vld [vmem:[%s4601_s10 + $0x38] sm:$0xff] }
 0x5df   :  { %v2827_v16 = vpop.eup %2826  ;;  %v1646_v27 = vadd.f32 %v4137_v17, %v1578_v18  ;;  %2439 = vmatmul.msk.f32.gmra.mxu0 %vm356_vm2, %v4787_v36  ;;  %2471 = vmatmul.msk.f32.gmra.mxu1 %vm356_vm2, %v4844_v23  ;;  %v1551_v36 = vadd.f32 %v4179_v63, %v4177_v38  ;;  %v1640_v38 = vadd.f32 %v4137_v17, %v4199_v35  ;;  %v2921_v35 = vld [vmem:[%s4601_s10 + $0x78] sm:$0xff] }
 0x5e0   :  { %v1709_v48 = vmul.f32 %v2919_v9, %v2827_v16  ;;  %v1635_v18 = vadd.f32 %v4137_v17, %v1545_v45  ;;  %v1539_v9 = vadd.f32 %v4146_v8, %v4144_v22 }
 0x5e1   :  { %2828 = vtanh.f32 %v1646_v27  ;;  %v1637_v12 = vadd.f32 %v4137_v17, %v1551_v36 }
 0x5e2   :  { %1908 = vperm.xlu0 %2747, %v1709_v48   ;;  %2830 = vtanh.f32 %v1639_v1  ;;  %v1548_v48 = vadd.f32 %v4171_v58, %v4169_v29  ;;  %v2923_v1 = vld [vmem:[%s4601_s10 + $0x40] sm:$0xff]  ;;  %v1633_v36 = vadd.f32 %v4137_v17, %v1539_v9 }
 0x5e4   :  { %v1467_v32 = vpop.f32.mrf.mxu0  ;;  %v1580_v15 = vpop.f32.mrf.mxu1  ;;  %v1636_v22 = vadd.f32 %v4137_v17, %v1548_v48 }
 0x5e5   :  { %v1581_v24 = vadd.f32 %v1580_v15, %v1467_v32  ;;  %v2924_v15 = vld [vmem:[%s4601_s10 + $0x28] sm:$0xff] }
 0x5e7   :  { %v2829_v30 = vpop.eup %2828  ;;  %v1647_v25 = vadd.f32 %v4137_v17, %v1581_v24  ;;  %2440 = vmatmul.msk.f32.gmra.mxu0 %vm356_vm2, %v4788_v57  ;;  %2472 = vmatmul.msk.f32.gmra.mxu1 %vm356_vm2, %v4845_v51  ;;  %v4295_v57 = vpop.f32.mrf.mxu2 }
 0x5e8   :  { %v1710_v3 = vmul.f32 %v2920_v42, %v2829_v30  ;;  %v2831_v55 = vpop.eup %2830  ;;  %2504 = vmatmul.msk.f32.gmra.mxu2 %vm356_vm2, %v4845_v51  ;;  %v1542_v42 = vadd.f32 %v4155_v26, %v4153_v37 }
 0x5e9   :  { %2832 = vtanh.f32 %v1647_v25  ;;  %v1703_v6 = vmul.f32 %v2922_v20, %v2831_v55  ;;  %v2928_v20 = vld [vmem:[%s4601_s10 + $0x8] sm:$0xff] }
 0x5ea   :  { %1913 = vperm.xlu0 %2747, %v1710_v3   ;;  %2834 = vtanh.f32 %v1637_v12  ;;  %v2925_v3 = vld [vmem:[%s4601_s10 + $0x30] sm:$0xff] }
 0x5eb   :  { %2836 = vtanh.f32 %v1640_v38  ;;  %v2926_v38 = vld [vmem:[%s4601_s10 + $0x18] sm:$0xff] }
 0x5ec   :  { %v1470_v63 = vpop.f32.mrf.mxu0  ;;  %v1583_v41 = vpop.f32.mrf.mxu1  ;;  %2838 = vtanh.f32 %v1635_v18 }
 0x5ed   :  { %v4293_v53 = vadd.f32 %v1583_v41, %v1470_v63  ;;  %2840 = vtanh.f32 %v1638_v47  ;;  %v1634_v41 = vadd.f32 %v4137_v17, %v1542_v42 }
 0x5ee   :  { %2842 = vtanh.f32 %v1633_v36 }
 0x5ef   :  { %v2833_v5 = vpop.eup %2832  ;;  %v4313_v23 = vpop.f32.mrf.mxu2  ;;  %2844 = vtanh.f32 %v1636_v22 }
 0x5f0   :  { %v1711_v52 = vmul.f32 %v2921_v35, %v2833_v5  ;;  %v2835_v19 = vpop.eup %2834  ;;  %2846 = vtanh.f32 %v1634_v41  ;;  %v2927_v35 = vld [vmem:[%s4601_s10 + $0x20] sm:$0xff] }
 0x5f1   :  { %v2837_v11 = vpop.eup %2836  ;;  %v1701_v24 = vmul.f32 %v2924_v15, %v2835_v19 }
 0x5f2   :  { %1918 = vperm.xlu2 %2748, %v1711_v52   ;;  %1878 = vperm.xlu0 %2747, %v1703_v6   ;;  %v1704_v32 = vmul.f32 %v2923_v1, %v2837_v11  ;;  %v2839_v8 = vpop.eup %2838  ;;  %v2929_v11 = vld [vmem:[%s4601_s10 + $0x10] sm:$0xff] }
 0x5f3   :  { %v2841_v58 = vpop.eup %2840  ;;  %v1699_v63 = vmul.f32 %v2926_v38, %v2839_v8 }
 0x5f4   :  { %v1473_v16 = vpop.f32.mrf.mxu0  ;;  %v1586_v46 = vpop.f32.mrf.mxu1  ;;  %v1702_v12 = vmul.f32 %v2925_v3, %v2841_v58 }
 0x5f5   :  { %v4311_v27 = vadd.f32 %v1586_v46, %v1473_v16  ;;  %v2843_v55 = vpop.eup %2842 }
 0x5f6   :  { %v2845_v60 = vpop.eup %2844  ;;  %v1697_v6 = vmul.f32 %v2928_v20, %v2843_v55  ;;  %v2930_v20 = vld [vmem:[%s4601_s10 + $0xc0] sm:$0xff] }
 0x5f7   :  { %v4329_v51 = vpop.f32.mrf.mxu2  ;;  %v1700_v52 = vmul.f32 %v2927_v35, %v2845_v60  ;;  %v2847_v19 = vpop.eup %2846 }
 0x5f8   :  { %v1698_v9 = vmul.f32 %v2929_v11, %v2847_v19 }
 0x5fa   :  { %1883 = vperm.xlu2 %2748, %v1704_v32   ;;  %1868 = vperm.xlu0 %2747, %v1701_v24  }
 0x5fc   :  { %v1476_v30 = vpop.f32.mrf.mxu0  ;;  %v1589_v29 = vpop.f32.mrf.mxu1 }
 0x5fd   :  { %v4327_v25 = vadd.f32 %v1589_v29, %v1476_v30 }
 0x5ff   :  { %v4342_v26 = vpop.f32.mrf.mxu2 }
 0x602   :  { %1873 = vperm.xlu2 %2748, %v1702_v12   ;;  %1858 = vperm.xlu0 %2747, %v1699_v63  }
 0x604   :  { %v1479_v45 = vpop.f32.mrf.mxu0  ;;  %v1592_v5 = vpop.f32.mrf.mxu1 }
 0x605   :  { %v4340_v37 = vadd.f32 %v1592_v5, %v1479_v45 }
 0x607   :  { %v4352_v46 = vpop.f32.mrf.mxu2 }
 0x60a   :  { %1863 = vperm.xlu2 %2748, %v1700_v52   ;;  %1848 = vperm.xlu0 %2747, %v1697_v6  }
 0x60c   :  { %v1482_v18 = vpop.f32.mrf.mxu0  ;;  %v1595_v47 = vpop.f32.mrf.mxu1 }
 0x60d   :  { %v4350_v16 = vadd.f32 %v1595_v47, %v1482_v18 }
 0x60f   :  { %v4359_v15 = vpop.f32.mrf.mxu2 }
 0x612   :  { %1853 = vperm.xlu2 %2748, %v1698_v9  }
 0x614   :  { %v1485_v48 = vpop.f32.mrf.mxu0  ;;  %v1598_v1 = vpop.f32.mrf.mxu1 }
 0x615   :  { %v4357_v32 = vadd.f32 %v1598_v1, %v1485_v48 }
 0x617   :  { %v4363_v8 = vpop.f32.mrf.mxu2 }
 0x61c   :  { %v1488_v24 = vpop.f32.mrf.mxu0  ;;  %v1601_v36 = vpop.f32.mrf.mxu1 }
 0x61d   :  { %v4361_v22 = vadd.f32 %v1601_v36, %v1488_v24  ;;  %v2931_v24 = vld [vmem:[%s4601_s10 + $0xc8] sm:$0xff] }
 0x61f   :  { %v4367_v42 = vpop.f32.mrf.mxu2 }
 0x624   :  { %v1491_v30 = vpop.f32.mrf.mxu0  ;;  %v1604_v29 = vpop.f32.mrf.mxu1 }
 0x625   :  { %v4365_v58 = vadd.f32 %v1604_v29, %v1491_v30  ;;  %v4376_v19 = vpop.permute.xlu2 %1893 }
 0x627   :  { %v1790_v63 = vpop.f32.mrf.mxu2 }
 0x62c   :  { %v1494_v3 = vpop.f32.mrf.mxu0  ;;  %v1607_v12 = vpop.f32.mrf.mxu1 }
 0x62d   :  { %v1608_v38 = vadd.f32 %v1607_v12, %v1494_v3 }
 0x62f   :  { %v1656_v41 = vadd.f32 %v4137_v17, %v1608_v38  ;;  %v4370_v60 = vpop.f32.mrf.mxu2 }
 0x631   :  { %2848 = vtanh.f32 %v1656_v41 }
 0x634   :  { %v1497_v55 = vpop.f32.mrf.mxu0  ;;  %v1610_v45 = vpop.f32.mrf.mxu1 }
 0x635   :  { %v1611_v5 = vadd.f32 %v1610_v45, %v1497_v55  ;;  %v1904_v3 = vpop.permute.xlu2 %1903  ;;  %v4384_v12 = vpop.permute.xlu0 %1888 }
 0x637   :  { %v2849_v35 = vpop.eup %2848  ;;  %v1657_v52 = vadd.f32 %v4137_v17, %v1611_v5  ;;  %v4378_v9 = vpop.f32.mrf.mxu2  ;;  %v2932_v5 = vld [vmem:[%s4601_s10 + $0xd0] sm:$0xff] }
 0x638   :  { %v1720_v6 = vmul.f32 %v2930_v20, %v2849_v35 }
 0x639   :  { %2850 = vtanh.f32 %v1657_v52 }
 0x63a   :  { %1963 = vperm.xlu0 %2747, %v1720_v6  }
 0x63c   :  { %v1500_v18 = vpop.f32.mrf.mxu0  ;;  %v1613_v47 = vpop.f32.mrf.mxu1 }
 0x63d   :  { %v1614_v11 = vadd.f32 %v1613_v47, %v1500_v18 }
 0x63f   :  { %v2851_v48 = vpop.eup %2850  ;;  %v1658_v1 = vadd.f32 %v4137_v17, %v1614_v11  ;;  %v4387_v45 = vpop.f32.mrf.mxu2 }
 0x640   :  { %v1721_v36 = vmul.f32 %v2931_v24, %v2851_v48  ;;  %v2933_v24 = vld [vmem:[%s4601_s10 + $0xd8] sm:$0xff] }
 0x641   :  { %2852 = vtanh.f32 %v1658_v1 }
 0x642   :  { %1968 = vperm.xlu2 %2748, %v1721_v36  }
 0x644   :  { %v1503_v30 = vpop.f32.mrf.mxu0  ;;  %v1616_v29 = vpop.f32.mrf.mxu1 }
 0x645   :  { %v1617_v38 = vadd.f32 %v1616_v29, %v1503_v30  ;;  %v1899_v6 = vpop.permute.xlu0 %1898 }
 0x647   :  { %v2853_v41 = vpop.eup %2852  ;;  %v1659_v55 = vadd.f32 %v4137_v17, %v1617_v38  ;;  %v4396_v30 = vpop.f32.mrf.mxu2 }
 0x648   :  { %v1722_v35 = vmul.f32 %v2932_v5, %v2853_v41 }
 0x649   :  { %2854 = vtanh.f32 %v1659_v55 }
 0x64a   :  { %1973 = vperm.xlu0 %2747, %v1722_v35  }
 0x64c   :  { %v1506_v52 = vpop.f32.mrf.mxu0  ;;  %v1619_v20 = vpop.f32.mrf.mxu1 }
 0x64d   :  { %v1620_v18 = vadd.f32 %v1619_v20, %v1506_v52  ;;  %v1919_v47 = vpop.permute.xlu2 %1918  ;;  %v2934_v52 = vld [vmem:[%s4601_s10 + $0xe0] sm:$0xff] }
 0x64e   :  { %v2016_v11 = vmul.f32 %v1919_v47, %v1790_v63 }
 0x64f   :  { %v2855_v48 = vpop.eup %2854  ;;  %v1660_v1 = vadd.f32 %v4137_v17, %v1620_v18  ;;  %v4402_v18 = vpop.f32.mrf.mxu2 }
 0x650   :  { %2033 = vmatpush.msra.mxu3 %v2016_v11  ;;  %v1723_v36 = vmul.f32 %v2933_v24, %v2855_v48 }
 0x651   :  { %2856 = vtanh.f32 %v1660_v1 }
 0x652   :  { %1978 = vperm.xlu2 %2748, %v1723_v36  }
 0x654   :  { %v1509_v29 = vpop.f32.mrf.mxu0  ;;  %v1622_v38 = vpop.f32.mrf.mxu1 }
 0x655   :  { %v1623_v41 = vadd.f32 %v1622_v38, %v1509_v29  ;;  %v1909_v55 = vpop.permute.xlu0 %1908  ;;  %v1884_v35 = vpop.permute.xlu2 %1883 }
 0x656   :  { %v2014_v38 = vmul.f32 %v1909_v55, %v4363_v8 }
 0x657   :  { %v2857_v5 = vpop.eup %2856  ;;  %v1661_v63 = vadd.f32 %v4137_v17, %v1623_v41  ;;  %v2935_v41 = vld [vmem:[%s4601_s10 + $0xe8] sm:$0xff] }
 0x658   :  { %v1724_v20 = vmul.f32 %v2934_v52, %v2857_v5  ;;  %v2013_v52 = vmul.f32 %v1904_v3, %v4359_v15 }
 0x659   :  { %2858 = vtanh.f32 %v1661_v63 }
 0x65a   :  { %1983 = vperm.xlu0 %2747, %v1724_v20   ;;  %v2012_v20 = vmul.f32 %v1899_v6, %v4352_v46  ;;  %v2936_v46 = vld [vmem:[%s4601_s10 + $0xf0] sm:$0xff]  ;;  %v2009_v6 = vmul.f32 %v1884_v35, %v4313_v23 }
 0x65c   :  { %v1512_v47 = vpop.f32.mrf.mxu0  ;;  %v1625_v11 = vpop.f32.mrf.mxu1 }
 0x65d   :  { %v1626_v48 = vadd.f32 %v1625_v11, %v1512_v47  ;;  %v1914_v1 = vpop.permute.xlu0 %1913  ;;  %v1874_v63 = vpop.permute.xlu2 %1873 }
 0x65e   :  { %v2015_v24 = vmul.f32 %v1914_v1, %v4367_v42  ;;  %v1654_v42 = vadd.f32 %v4137_v17, %v4361_v22  ;;  %v4416_v1 = vpop.f32.mrf.mxu2  ;;  %v2010_v22 = vmul.f32 %v4384_v12, %v4329_v51 }
 0x65f   :  { %v2859_v36 = vpop.eup %2858  ;;  %v1662_v29 = vadd.f32 %v4137_v17, %v1626_v48  ;;  %v2011_v48 = vmul.f32 %v4376_v19, %v4342_v26  ;;  %v1655_v26 = vadd.f32 %v4137_v17, %v4365_v58  ;;  %v2937_v58 = vld [vmem:[%s4601_s10 + $0xf8] sm:$0xff] }
 0x660   :  { %2034 = vmatpush.msra.mxu3 %v2015_v24  ;;  %v1725_v5 = vmul.f32 %v2935_v41, %v2859_v36  ;;  %v1652_v36 = vadd.f32 %v4137_v17, %v4350_v16 }
 0x661   :  { %2860 = vtanh.f32 %v1662_v29 }
 0x662   :  { %2035 = vmatpush.msra.mxu3 %v2014_v38  ;;  %1988 = vperm.xlu2 %2748, %v1725_v5   ;;  %2862 = vtanh.f32 %v1654_v42  ;;  %v2007_v38 = vmul.f32 %v1874_v63, %v4276_v33  ;;  %v1650_v63 = vadd.f32 %v4137_v17, %v4327_v25  ;;  %v2940_v25 = vld [vmem:[%s4601_s10 + $0xa0] sm:$0xff] }
 0x664   :  { %2036 = vmatpush.msra.mxu3 %v2013_v52  ;;  %v1515_v47 = vpop.f32.mrf.mxu0  ;;  %v1628_v8 = vpop.f32.mrf.mxu1 }
 0x665   :  { %v1629_v55 = vadd.f32 %v1628_v8, %v1515_v47  ;;  %v1879_v11 = vpop.permute.xlu0 %1878  ;;  %v1864_v19 = vpop.permute.xlu2 %1863 }
 0x666   :  { %2037 = vmatpush.msra.mxu3 %v2012_v20  ;;  %v2008_v51 = vmul.f32 %v1879_v11, %v4295_v57  ;;  %v4435_v16 = vpop.f32.mrf.mxu2  ;;  %v2938_v57 = vld [vmem:[%s4601_s10 + $0xb0] sm:$0xff]  ;;  %v2005_v33 = vmul.f32 %v1864_v19, %v4250_v44 }
 0x667   :  { %v2861_v24 = vpop.eup %2860  ;;  %v1663_v15 = vadd.f32 %v4137_v17, %v1629_v55 }
 0x668   :  { %2038 = vmatpush.msra.mxu3 %v2011_v48  ;;  %v1726_v3 = vmul.f32 %v2936_v46, %v2861_v24  ;;  %v2863_v29 = vpop.eup %2862 }
 0x669   :  { %2864 = vtanh.f32 %v1663_v15  ;;  %v1718_v5 = vmul.f32 %v2938_v57, %v2863_v29  ;;  %v1844_v15 = vpop.permute.xlu1 %1843 }
 0x66a   :  { %2039 = vmatpush.msra.mxu3 %v2010_v22  ;;  %1993 = vperm.xlu0 %2747, %v1726_v3   ;;  %2866 = vtanh.f32 %v1655_v26  ;;  %v2941_v26 = vld [vmem:[%s4601_s10 + $0xa8] sm:$0xff] }
 0x66b   :  { %2868 = vtanh.f32 %v1652_v36 }
 0x66c   :  { %2040 = vmatpush.msra.mxu3 %v2009_v6  ;;  %v2001_v6 = vmul.f32 %v1844_v15, %v4205_v62 }
 0x66d   :  { %v1869_v12 = vpop.permute.xlu0 %1868  ;;  %v1854_v42 = vpop.permute.xlu2 %1853 }
 0x66e   :  { %2041 = vmatpush.msra.mxu3 %v2008_v51  ;;  %v2006_v23 = vmul.f32 %v1869_v12, %v4262_v0  ;;  %v1653_v0 = vadd.f32 %v4137_v17, %v4357_v32  ;;  %v2003_v44 = vmul.f32 %v1854_v42, %v4226_v4  ;;  %v2939_v32 = vld [vmem:[%s4601_s10 + $0xb8] sm:$0xff]  ;;  %v4453_v48 = vpop.f32.mrf.mxu2  ;;  %v1648_v4 = vadd.f32 %v4137_v17, %v4293_v53  ;;  %v2942_v53 = vld [vmem:[%s4601_s10 + $0x90] sm:$0xff] }
 0x66f   :  { %v2865_v41 = vpop.eup %2864  ;;  %v2943_v12 = vld [vmem:[%s4601_s10 + $0x98] sm:$0xff] }
 0x670   :  { %2042 = vmatpush.msra.mxu3 %v2007_v38  ;;  %v1727_v35 = vmul.f32 %v2937_v58, %v2865_v41  ;;  %v2867_v52 = vpop.eup %2866  ;;  %2870 = vtanh.f32 %v1653_v0  ;;  %v2944_v38 = vld [vmem:[%s4601_s10 + $0x80] sm:$0xff] }
 0x671   :  { %v2869_v47 = vpop.eup %2868  ;;  %2872 = vtanh.f32 %v1650_v63  ;;  %v1719_v55 = vmul.f32 %v2939_v32, %v2867_v52 }
 0x672   :  { %2043 = vmatpush.msra.mxu3 %v2006_v23  ;;  %1998 = vperm.xlu2 %2748, %v1727_v35   ;;  %v1716_v11 = vmul.f32 %v2940_v25, %v2869_v47  ;;  %v2945_v23 = vld [vmem:[%s4601_s10 + $0x88] sm:$0xff] }
 0x673   :  { %1953 = vperm.xlu0 %2747, %v1718_v5  }
 0x674   :  { %2044 = vmatpush.msra.mxu3 %v2005_v33 }
 0x675   :  { %v1859_v20 = vpop.permute.xlu0 %1858 }
 0x676   :  { %v2004_v8 = vmul.f32 %v1859_v20, %v4238_v7  ;;  %v1651_v7 = vadd.f32 %v4137_v17, %v4340_v37  ;;  %v2871_v24 = vpop.eup %2870  ;;  %v1817_v36 = vpop.f32.mrf.mxu2 }
 0x677   :  { %v2873_v46 = vpop.eup %2872  ;;  %v1717_v37 = vmul.f32 %v2941_v26, %v2871_v24 }
 0x678   :  { %2045 = vmatpush.msra.mxu3 %v2004_v8  ;;  %2874 = vtanh.f32 %v1651_v7  ;;  %v1714_v19 = vmul.f32 %v2942_v53, %v2873_v46 }
 0x679   :  { %2876 = vtanh.f32 %v1648_v4 }
 0x67a   :  { %2046 = vmatpush.msra.mxu3 %v2003_v44  ;;  %1958 = vperm.xlu2 %2748, %v1719_v55  }
 0x67b   :  { %1943 = vperm.xlu0 %2747, %v1716_v11  }
 0x67d   :  { %v1849_v22 = vpop.permute.xlu0 %1848 }
 0x67e   :  { %v2002_v3 = vmul.f32 %v1849_v22, %v4214_v54  ;;  %v1649_v54 = vadd.f32 %v4137_v17, %v4311_v27  ;;  %v2875_v62 = vpop.eup %2874  ;;  %v1820_v27 = vpop.f32.mrf.mxu2 }
 0x67f   :  { %v2877_v51 = vpop.eup %2876  ;;  %v1715_v29 = vmul.f32 %v2943_v12, %v2875_v62 }
 0x680   :  { %2047 = vmatpush.msra.mxu3 %v2002_v3  ;;  %2878 = vtanh.f32 %v1649_v54  ;;  %v1712_v41 = vmul.f32 %v2944_v38, %v2877_v51 }
 0x682   :  { %2048 = vmatpush.msra.mxu3 %v2001_v6  ;;  %1948 = vperm.xlu2 %2748, %v1717_v37  }
 0x683   :  { %1933 = vperm.xlu0 %2747, %v1714_v19   ;;  %2738 = vmatmul.lmr.bf16.vlgmr.msra.gmra.8.mxu3 }
 0x686   :  { %v2879_v17 = vpop.eup %2878  ;;  %v1823_v35 = vpop.f32.mrf.mxu2 }
 0x687   :  { %v1713_v58 = vmul.f32 %v2945_v23, %v2879_v17 }
 0x68a   :  { %1938 = vperm.xlu2 %2748, %v1715_v29  }
 0x68b   :  { %1923 = vperm.xlu0 %2747, %v1712_v41   ;;  %2739 = vmatmul.lmr.bf16.gmra.8.mxu3 }
 0x68e   :  { %v1826_v57 = vpop.f32.mrf.mxu2 }
 0x692   :  { %1928 = vperm.xlu2 %2748, %v1713_v58  }
 0x693   :  { %2740 = vmatmul.lmr.bf16.gmra.8.mxu3 }
 0x696   :  { %v1829_v5 = vpop.f32.mrf.mxu2 }
 0x69b   :  { %2741 = vmatmul.lmr.bf16.gmra.8.mxu3 }
 0x69c   :  { %v1969_v33 = vpop.permute.xlu2 %1968 }
 0x69d   :  { %v2026_v6 = vmul.f32 %v1969_v33, %v1820_v27 }
 0x69e   :  { %v1832_v0 = vpop.f32.mrf.mxu2 }
 0x6a3   :  { %2742 = vmatmul.lmr.bf16.gmra.8.mxu3 }
 0x6a6   :  { %v1835_v52 = vpop.f32.mrf.mxu2 }
 0x6ab   :  { %2743 = vmatmul.lmr.bf16.gmra.8.mxu3 }
 0x6ac   :  { %v1979_v63 = vpop.permute.xlu2 %1978  ;;  %v1964_v42 = vpop.permute.xlu0 %1963 }
 0x6ad   :  { %v2028_v22 = vmul.f32 %v1979_v63, %v1826_v57  ;;  %v2025_v26 = vmul.f32 %v1964_v42, %v1817_v36 }
 0x6ae   :  { %v1838_v47 = vpop.f32.mrf.mxu2 }
 0x6b3   :  { %2744 = vmatmul.lmr.bf16.gmra.8.mxu3 }
 0x6bb   :  { %2745 = vmatmul.lmr.bf16.gmra.8.mxu3 }
 0x6bc   :  { %v1989_v20 = vpop.permute.xlu2 %1988  ;;  %v1974_v8 = vpop.permute.xlu0 %1973 }
 0x6bd   :  { %v2030_v4 = vmul.f32 %v1989_v20, %v1832_v0  ;;  %v2027_v46 = vmul.f32 %v1974_v8, %v1823_v35 }
 0x6cc   :  { %v1999_v44 = vpop.permute.xlu2 %1998  ;;  %v1984_v55 = vpop.permute.xlu0 %1983 }
 0x6cd   :  { %v2032_v32 = vmul.f32 %v1999_v44, %v1838_v47  ;;  %v2029_v24 = vmul.f32 %v1984_v55, %v1829_v5 }
 0x6cf   :  { %2074 = vmatpush.msra.mxu3 %v2032_v32 }
 0x6d4   :  { %v1959_v25 = vpop.permute.xlu2 %1958 }
 0x6d5   :  { %v2024_v37 = vmul.f32 %v1959_v25, %v4453_v48 }
 0x6dc   :  { %v1994_v11 = vpop.permute.xlu0 %1993  ;;  %v1949_v15 = vpop.permute.xlu2 %1948 }
 0x6dd   :  { %v2031_v7 = vmul.f32 %v1994_v11, %v1835_v52  ;;  %v2022_v62 = vmul.f32 %v1949_v15, %v4416_v1 }
 0x6df   :  { %2075 = vmatpush.msra.mxu3 %v2031_v7 }
 0x6e1   :  { %2076 = vmatpush.msra.mxu3 %v2030_v4 }
 0x6e3   :  { %2077 = vmatpush.msra.mxu3 %v2029_v24 }
 0x6e4   :  { %v1939_v53 = vpop.permute.xlu2 %1938 }
 0x6e5   :  { %v1954_v3 = vpop.permute.xlu0 %1953  ;;  %2078 = vmatpush.msra.mxu3 %v2028_v22  ;;  %v2020_v12 = vmul.f32 %v1939_v53, %v4396_v30 }
 0x6e6   :  { %v2023_v19 = vmul.f32 %v1954_v3, %v4435_v16 }
 0x6e7   :  { %2079 = vmatpush.msra.mxu3 %v2027_v46 }
 0x6e9   :  { %2080 = vmatpush.msra.mxu3 %v2026_v6 }
 0x6eb   :  { %2081 = vmatpush.msra.mxu3 %v2025_v26 }
 0x6ec   :  { %v1929_v29 = vpop.permute.xlu2 %1928 }
 0x6ed   :  { %v1944_v54 = vpop.permute.xlu0 %1943  ;;  %2082 = vmatpush.msra.mxu3 %v2024_v37  ;;  %v2018_v38 = vmul.f32 %v1929_v29, %v4378_v9  ;;  %v2126_v9 = vld [vmem:[%s4602_s3 + $0x18] sm:$0xff] }
 0x6ee   :  { %v2021_v51 = vmul.f32 %v1944_v54, %v4402_v18 }
 0x6ef   :  { %2083 = vmatpush.msra.mxu3 %v2023_v19 }
 0x6f1   :  { %2084 = vmatpush.msra.mxu3 %v2022_v62 }
 0x6f3   :  { %2085 = vmatpush.msra.mxu3 %v2021_v51 }
 0x6f5   :  { %v1934_v36 = vpop.permute.xlu0 %1933  ;;  %2086 = vmatpush.msra.mxu3 %v2020_v12 }
 0x6f6   :  { %v2019_v48 = vmul.f32 %v1934_v36, %v4387_v45 }
 0x6f8   :  { %2087 = vmatpush.msra.mxu3 %v2019_v48 }
 0x6fa   :  { %2088 = vmatpush.msra.mxu3 %v2018_v38 }
 0x6fd   :  { %v1924_v16 = vpop.permute.xlu0 %1923 }
 0x6fe   :  { %v2017_v41 = vmul.f32 %v1924_v16, %v4370_v60 }
 0x700   :  { %2089 = vmatpush.msra.mxu3 %v2017_v41 }
 0x701   :  { %2090 = vmatmul.f32.vlgmr.msra.gmra.mxu3 %v3910_v40 }
 0x702   :  { %2167 = vmatpush.msra.mxu3 %v2126_v9 }
 0x706   :  { %v2050_v60 = vpop.f32.mrf.mxu3 }
 0x709   :  { %2093 = vmatmul.f32.gmra.mxu3 %v3913_v21 }
 0x70e   :  { %v2053_v40 = vpop.f32.mrf.mxu3 }
 0x711   :  { %2096 = vmatmul.f32.gmra.mxu3 %v3916_v14 }
 0x716   :  { %v2056_v21 = vpop.f32.mrf.mxu3 }
 0x719   :  { %2099 = vmatmul.f32.gmra.mxu3 %v3919_v56  ;;  %v2125_v56 = vld [vmem:[%s4602_s3 + $0x10] sm:$0xff] }
 0x71a   :  { %2168 = vmatpush.msra.mxu3 %v2125_v56 }
 0x71e   :  { %v2059_v45 = vpop.f32.mrf.mxu3 }
 0x721   :  { %2102 = vmatmul.f32.gmra.mxu3 %v3922_v34  ;;  %v2124_v34 = vld [vmem:[%s4602_s3 + $0x8] sm:$0xff] }
 0x722   :  { %2169 = vmatpush.msra.mxu3 %v2124_v34 }
 0x726   :  { %v2062_v14 = vpop.f32.mrf.mxu3 }
 0x729   :  { %2105 = vmatmul.f32.gmra.mxu3 %v3925_v10 }
 0x72e   :  { %v2065_v10 = vpop.f32.mrf.mxu3 }
 0x731   :  { %2108 = vmatmul.f32.gmra.mxu3 %v3930_v49  ;;  %v2123_v49 = vld [vmem:[%s4602_s3] sm:$0xff] }
 0x732   :  { %2170 = vmatpush.msra.mxu3 %v2123_v49 }
 0x739   :  { %2111 = vmatmul.f32.gmra.mxu3 %v3933_v59  ;;  %v2068_v59 = vpop.f32.mrf.mxu3 }
 0x741   :  { %v2071_v30 = vpop.f32.mrf.mxu3 }
 0x784   :  { %v2091_v18 = vpop.f32.mrf.mxu3 }
 0x785   :  { %v2092_v1 = vadd.f32 %v2091_v18, %v2050_v60 }
 0x787   :  { %v2115_v17 = vadd.f32 %v2092_v1, %v4012_v2 }
 0x789   :  { %2505 = vmatmul.msk.f32.vlgmr.msra.gmra.mxu3 %vm298_vm1, %v2115_v17 }
 0x78c   :  { %v2094_v27 = vpop.f32.mrf.mxu3 }
 0x78d   :  { %v2095_v23 = vadd.f32 %v2094_v27, %v2053_v40 }
 0x78f   :  { %v2116_v58 = vadd.f32 %v2095_v23, %v4000_v61 }
 0x791   :  { %2506 = vmatmul.msk.f32.gmra.mxu3 %vm298_vm1, %v2116_v58 }
 0x794   :  { %v2097_v35 = vpop.f32.mrf.mxu3 }
 0x795   :  { %v2098_v57 = vadd.f32 %v2097_v35, %v2056_v21 }
 0x797   :  { %v2117_v5 = vadd.f32 %v2098_v57, %v3941_v39 }
 0x799   :  { %2507 = vmatmul.msk.f32.gmra.mxu3 %vm298_vm1, %v2117_v5 }
 0x79c   :  { %v2100_v33 = vpop.f32.mrf.mxu3 }
 0x79d   :  { %v2101_v0 = vadd.f32 %v2100_v33, %v2059_v45 }
 0x79f   :  { %v2118_v63 = vadd.f32 %v2101_v0, %v3963_v43 }
 0x7a1   :  { %2508 = vmatmul.msk.f32.gmra.mxu3 %vm298_vm1, %v2118_v63 }
 0x7a4   :  { %v2103_v2 = vpop.f32.mrf.mxu3 }
 0x7a5   :  { %v2104_v52 = vadd.f32 %v2103_v2, %v2062_v14 }
 0x7a7   :  { %v2119_v42 = vadd.f32 %v2104_v52, %v3971_v28  ;;  %v2751_v28 = vld [vmem:[%s4603_s4] ss:$0 sm:$0xff] }
 0x7a9   :  { %2509 = vmatmul.msk.f32.gmra.mxu3 %vm298_vm1, %v2119_v42 }
 0x7ac   :  { %v2106_v61 = vpop.f32.mrf.mxu3 }
 0x7ad   :  { %v2107_v20 = vadd.f32 %v2106_v61, %v2065_v10 }
 0x7af   :  { %v2120_v47 = vadd.f32 %v2107_v20, %v3979_v31 }
 0x7b1   :  { %2510 = vmatmul.msk.f32.gmra.mxu3 %vm298_vm1, %v2120_v47 }
 0x7b4   :  { %v2109_v39 = vpop.f32.mrf.mxu3 }
 0x7b5   :  { %v2110_v8 = vadd.f32 %v2109_v39, %v2068_v59 }
 0x7b7   :  { %v2121_v44 = vadd.f32 %v2110_v8, %v3987_v13 }
 0x7b9   :  { %2511 = vmatmul.msk.f32.gmra.mxu3 %vm298_vm1, %v2121_v44 }
 0x7bc   :  { %v2112_v43 = vpop.f32.mrf.mxu3 }
 0x7bd   :  { %v2113_v32 = vadd.f32 %v2112_v43, %v2071_v30 }
 0x7bf   :  { %v2122_v55 = vadd.f32 %v2113_v32, %v3995_v50 }
 0x7c1   :  { %2512 = vmatmul.msk.f32.gmra.mxu3 %vm298_vm1, %v2122_v55 }
 0x80c   :  { %v2172_v25 = vpop.f32.mrf.mxu3 }
 0x80d   :  { %v2173_v31 = vadd.f32 %v2751_v28, %v2172_v25 }
 0x80f   :  { %v2197_v11 = vsel %vm2196_vm3, %v2173_v31, -inf }
 0x810   :  { %2198 = vmax.xlane.f32.xlu2 %v2197_v11 }
 0x814   :  { %v2175_v7 = vpop.f32.mrf.mxu3 }
 0x815   :  { %v2176_v13 = vadd.f32 %v2751_v28, %v2175_v7 }
 0x817   :  { %v2200_v4 = vsel %vm2196_vm3, %v2176_v13, -inf }
 0x818   :  { %2201 = vmax.xlane.f32.xlu0 %v2200_v4 }
 0x81c   :  { %v2178_v24 = vpop.f32.mrf.mxu3 }
 0x81d   :  { %v2179_v15 = vadd.f32 %v2751_v28, %v2178_v24 }
 0x81f   :  { %v2203_v50 = vsel %vm2196_vm3, %v2179_v15, -inf }
 0x820   :  { %2204 = vmax.xlane.f32.xlu1 %v2203_v50 }
 0x824   :  { %v2181_v22 = vpop.f32.mrf.mxu3 }
 0x825   :  { %v2182_v46 = vadd.f32 %v2751_v28, %v2181_v22 }
 0x827   :  { %v2206_v3 = vsel %vm2196_vm3, %v2182_v46, -inf }
 0x828   :  { %2207 = vmax.xlane.f32.xlu2 %v2206_v3 }
 0x82c   :  { %v2184_v6 = vpop.f32.mrf.mxu3 }
 0x82d   :  { %v2185_v26 = vadd.f32 %v2751_v28, %v2184_v6 }
 0x82f   :  { %v2209_v37 = vsel %vm2196_vm3, %v2185_v26, -inf }
 0x830   :  { %2210 = vmax.xlane.f32.xlu0 %v2209_v37 }
 0x834   :  { %v2187_v53 = vpop.f32.mrf.mxu3 }
 0x835   :  { %v2188_v19 = vadd.f32 %v2751_v28, %v2187_v53 }
 0x837   :  { %v2212_v54 = vsel %vm2196_vm3, %v2188_v19, -inf }
 0x838   :  { %2213 = vmax.xlane.f32.xlu2 %v2212_v54 }
 0x83c   :  { %v2190_v62 = vpop.f32.mrf.mxu3 }
 0x83d   :  { %v2191_v51 = vadd.f32 %v2751_v28, %v2190_v62 }
 0x83f   :  { %v2215_v12 = vsel %vm2196_vm3, %v2191_v51, -inf }
 0x840   :  { %2216 = vmax.xlane.f32.xlu0 %v2215_v12 }
 0x844   :  { %v2193_v29 = vpop.f32.mrf.mxu3 }
 0x845   :  { %v2194_v36 = vadd.f32 %v2751_v28, %v2193_v29 }
 0x847   :  { %v2218_v48 = vsel %vm2196_vm3, %v2194_v36, -inf }
 0x848   :  { %2219 = vmax.xlane.f32.xlu2 %v2218_v48 }
 0x883   :  { %v2199_v38 = vpop.xlane.xlu2 %2198 }
 0x884   :  { %v4533_v16 = vsub.f32 %v2173_v31, %v2199_v38 }
 0x886   :  { %v2229_v41 = vmul.f32 1.442695, %v4533_v16 }
 0x888   :  { %2880 = vpow2.f32 %v2229_v41 }
 0x88b   :  { %v2202_v9 = vpop.xlane.xlu0 %2201 }
 0x88c   :  { %v4536_v60 = vsub.f32 %v2176_v13, %v2202_v9 }
 0x88e   :  { %v2881_v40 = vpop.eup %2880  ;;  %v2231_v21 = vmul.f32 1.442695, %v4536_v60 }
 0x88f   :  { %v2245_v45 = vsel %vm2196_vm3, %v2881_v40, 0.0 }
 0x890   :  { %2882 = vpow2.f32 %v2231_v21  ;;  %2246 = vadd.xlane.f32.xlu0 %v2245_v45 }
 0x893   :  { %v2205_v14 = vpop.xlane.xlu1 %2204 }
 0x894   :  { %v4540_v56 = vsub.f32 %v2179_v15, %v2205_v14 }
 0x896   :  { %v2883_v34 = vpop.eup %2882  ;;  %v2233_v10 = vmul.f32 1.442695, %v4540_v56 }
 0x897   :  { %v2248_v49 = vsel %vm2196_vm3, %v2883_v34, 0.0 }
 0x898   :  { %2884 = vpow2.f32 %v2233_v10  ;;  %2249 = vadd.xlane.f32.xlu1 %v2248_v49 }
 0x89b   :  { %v2208_v59 = vpop.xlane.xlu2 %2207 }
 0x89c   :  { %v4544_v30 = vsub.f32 %v2182_v46, %v2208_v59 }
 0x89e   :  { %v2885_v18 = vpop.eup %2884  ;;  %v2235_v1 = vmul.f32 1.442695, %v4544_v30 }
 0x89f   :  { %v2251_v17 = vsel %vm2196_vm3, %v2885_v18, 0.0 }
 0x8a0   :  { %2886 = vpow2.f32 %v2235_v1  ;;  %2252 = vadd.xlane.f32.xlu2 %v2251_v17 }
 0x8a3   :  { %v2211_v27 = vpop.xlane.xlu0 %2210 }
 0x8a4   :  { %v4548_v23 = vsub.f32 %v2185_v26, %v2211_v27 }
 0x8a6   :  { %v2887_v58 = vpop.eup %2886  ;;  %v2237_v35 = vmul.f32 1.442695, %v4548_v23 }
 0x8a7   :  { %v2254_v57 = vsel %vm2196_vm3, %v2887_v58, 0.0 }
 0x8a8   :  { %2888 = vpow2.f32 %v2237_v35  ;;  %2255 = vadd.xlane.f32.xlu0 %v2254_v57 }
 0x8ab   :  { %v2214_v5 = vpop.xlane.xlu2 %2213 }
 0x8ac   :  { %v2226_v33 = vsub.f32 %v2188_v19, %v2214_v5 }
 0x8ae   :  { %v2889_v0 = vpop.eup %2888  ;;  %v2239_v63 = vmul.f32 1.442695, %v2226_v33 }
 0x8af   :  { %v2257_v2 = vsel %vm2196_vm3, %v2889_v0, 0.0 }
 0x8b0   :  { %2890 = vpow2.f32 %v2239_v63  ;;  %2258 = vadd.xlane.f32.xlu1 %v2257_v2 }
 0x8b3   :  { %v2217_v52 = vpop.xlane.xlu0 %2216 }
 0x8b4   :  { %v2227_v42 = vsub.f32 %v2191_v51, %v2217_v52 }
 0x8b6   :  { %v2891_v61 = vpop.eup %2890  ;;  %v2241_v20 = vmul.f32 1.442695, %v2227_v42 }
 0x8b7   :  { %v2260_v47 = vsel %vm2196_vm3, %v2891_v61, 0.0 }
 0x8b8   :  { %2892 = vpow2.f32 %v2241_v20  ;;  %2261 = vadd.xlane.f32.xlu2 %v2260_v47 }
 0x8bb   :  { %v2220_v39 = vpop.xlane.xlu2 %2219 }
 0x8bc   :  { %v2228_v8 = vsub.f32 %v2194_v36, %v2220_v39 }
 0x8be   :  { %v2893_v44 = vpop.eup %2892  ;;  %v2243_v43 = vmul.f32 1.442695, %v2228_v8 }
 0x8bf   :  { %v2263_v32 = vsel %vm2196_vm3, %v2893_v44, 0.0 }
 0x8c0   :  { %2894 = vpow2.f32 %v2243_v43  ;;  %2264 = vadd.xlane.f32.xlu0 %v2263_v32 }
 0x8c6   :  { %v2895_v55 = vpop.eup %2894 }
 0x8c7   :  { %v2266_v28 = vsel %vm2196_vm3, %v2895_v55, 0.0 }
 0x8c8   :  { %2267 = vadd.xlane.f32.xlu1 %v2266_v28 }
 0x903   :  { %v2247_v25 = vpop.xlane.xlu0 %2246 }
 0x904   :  { %2896 = vlog2.f32 %v2247_v25 }
 0x90a   :  { %v2897_v31 = vpop.eup %2896 }
 0x90b   :  { %v2270_v11 = vmul.f32 0.6931472, %v2897_v31  ;;  %v2250_v7 = vpop.xlane.xlu1 %2249 }
 0x90c   :  { %2898 = vlog2.f32 %v2250_v7 }
 0x90d   :  { %v2285_v13 = vsub.f32 %v4533_v16, %v2270_v11 }
 0x90f   :  { %2293 = vst.msk [vmem:[%s4604_s11] sm:$0xff] %vm2196_vm3, %v2285_v13 }
 0x912   :  { %v2899_v4 = vpop.eup %2898 }
 0x913   :  { %v2272_v24 = vmul.f32 0.6931472, %v2899_v4  ;;  %v2253_v15 = vpop.xlane.xlu2 %2252 }
 0x914   :  { %2900 = vlog2.f32 %v2253_v15 }
 0x915   :  { %v2286_v50 = vsub.f32 %v4536_v60, %v2272_v24 }
 0x917   :  { %2294 = vst.msk [vmem:[%s4604_s11 + $0x8] sm:$0xff] %vm2196_vm3, %v2286_v50 }
 0x91a   :  { %v2901_v22 = vpop.eup %2900 }
 0x91b   :  { %v2274_v46 = vmul.f32 0.6931472, %v2901_v22  ;;  %v2256_v3 = vpop.xlane.xlu0 %2255 }
 0x91c   :  { %2902 = vlog2.f32 %v2256_v3 }
 0x91d   :  { %v2287_v6 = vsub.f32 %v4540_v56, %v2274_v46 }
 0x91f   :  { %2295 = vst.msk [vmem:[%s4604_s11 + $0x10] sm:$0xff] %vm2196_vm3, %v2287_v6 }
 0x922   :  { %v2903_v26 = vpop.eup %2902 }
 0x923   :  { %v2276_v37 = vmul.f32 0.6931472, %v2903_v26  ;;  %v2259_v53 = vpop.xlane.xlu1 %2258 }
 0x924   :  { %2904 = vlog2.f32 %v2259_v53 }
 0x925   :  { %v2288_v19 = vsub.f32 %v4544_v30, %v2276_v37 }
 0x927   :  { %2296 = vst.msk [vmem:[%s4604_s11 + $0x18] sm:$0xff] %vm2196_vm3, %v2288_v19 }
 0x92a   :  { %v2905_v54 = vpop.eup %2904 }
 0x92b   :  { %v2278_v62 = vmul.f32 0.6931472, %v2905_v54  ;;  %v2262_v51 = vpop.xlane.xlu2 %2261 }
 0x92c   :  { %2906 = vlog2.f32 %v2262_v51 }
 0x92d   :  { %v2289_v12 = vsub.f32 %v4548_v23, %v2278_v62 }
 0x92f   :  { %2297 = vst.msk [vmem:[%s4604_s11 + $0x20] sm:$0xff] %vm2196_vm3, %v2289_v12 }
 0x932   :  { %v2907_v29 = vpop.eup %2906 }
 0x933   :  { %v2280_v36 = vmul.f32 0.6931472, %v2907_v29  ;;  %v2265_v48 = vpop.xlane.xlu0 %2264 }
 0x934   :  { %2908 = vlog2.f32 %v2265_v48 }
 0x935   :  { %v2290_v38 = vsub.f32 %v2226_v33, %v2280_v36 }
 0x937   :  { %2298 = vst.msk [vmem:[%s4604_s11 + $0x28] sm:$0xff] %vm2196_vm3, %v2290_v38 }
 0x93a   :  { %v2909_v16 = vpop.eup %2908 }
 0x93b   :  { %v2282_v41 = vmul.f32 0.6931472, %v2909_v16  ;;  %v2268_v9 = vpop.xlane.xlu1 %2267 }
 0x93c   :  { %2910 = vlog2.f32 %v2268_v9 }
 0x93d   :  { %v2291_v60 = vsub.f32 %v2227_v42, %v2282_v41 }
 0x93f   :  { %2299 = vst.msk [vmem:[%s4604_s11 + $0x30] sm:$0xff] %vm2196_vm3, %v2291_v60 }
 0x942   :  { %v2911_v40 = vpop.eup %2910 }
 0x943   :  { %v2284_v21 = vmul.f32 0.6931472, %v2911_v40 }
 0x945   :  { %v2292_v45 = vsub.f32 %v2228_v8, %v2284_v21 }
 0x947   :  { %2300 = vst.msk [vmem:[%s4604_s11 + $0x38] sm:$0xff] %vm2196_vm3, %v2292_v45 }

</bundles_post_ra>
